<compile_context>
chip_gen: v6e
topology: v6e:2x2x1
jax: 0.10.0
libtpu: 0.0.40
codegen_flags: <defaults>
</compile_context>

<pallas_src>
import math
from functools import partial

import numpy as np
import jax
import jax.numpy as jnp
from jax import lax
from jax.experimental import pallas as pl
from jax.experimental.pallas import tpu as pltpu


# ----------------------------------------------------------------------------
# Kernel: one (TM, Dp) row-tile of x against the full (Kp, Dp) codebook.
# ----------------------------------------------------------------------------
def _vq_bottleneck_kernel(x_ref, k_ref, kt_ref, k2_ref,
                          xd_ref, codes_ref, mind_ref, sqerr_ref,
                          xsum_ref, x2sum_ref, *, k_bins):
    x = x_ref[...]                                   # (TM, Dp) f32
    kt = kt_ref[...]                                 # (Dp, Kp) f32  (codebook^T)
    k2 = k2_ref[...]                                 # (1,  Kp) f32  (|k_j|^2)

    TM = x.shape[0]
    Kp = kt.shape[1]

    # distance(i, j) = |x_i|^2 - 2 x_i . k_j + |k_j|^2
    x2 = jnp.sum(x * x, axis=-1, keepdims=True)                      # (TM, 1)
    xk = jnp.dot(x, kt, preferred_element_type=jnp.float32)          # (TM, Kp) MXU
    dist = x2 - 2.0 * xk + k2                                        # (TM, Kp)

    col = lax.broadcasted_iota(jnp.int32, (TM, Kp), 1)
    if Kp != k_bins:                                  # mask padded codebook rows
        dist = jnp.where(col < k_bins, dist, jnp.float32(jnp.inf))

    min_d = jnp.min(dist, axis=-1, keepdims=True)                    # (TM, 1)
    # first index attaining the minimum (matches torch.min tie-breaking)
    codes = jnp.min(jnp.where(dist == min_d, col, Kp),
                    axis=-1, keepdims=True)                          # (TM, 1) i32

    # dequantise as one-hot @ codebook (MXU-friendly gather)
    onehot = (col == codes).astype(jnp.float32)                      # (TM, Kp)
    x_q = jnp.dot(onehot, k_ref[...],
                  preferred_element_type=jnp.float32)                # (TM, Dp)

    diff = x_q - x
    xd_ref[...] = x + diff                      # straight-through forward value
    codes_ref[...] = codes
    mind_ref[...] = min_d                                            # -> fit
    sqerr_ref[...] = jnp.sum(diff * diff, axis=-1, keepdims=True)    # -> commit
    xsum_ref[...] = jnp.sum(x, axis=-1, keepdims=True)               # -> prenorm
    x2sum_ref[...] = x2                                              # -> prenorm


def _round_up(a, b):
    return (a + b - 1) // b * b


# ----------------------------------------------------------------------------
# Wrapper: layout/padding + pallas_call + scalar finalisation.
# ----------------------------------------------------------------------------
def bottleneck_forward(x_nct, codebook, *, row_tile=256):
    """x_nct: (N, emb_width, T) f32; codebook: (k_bins, emb_width) f32.
       Returns (x_l (N,T) int32, x_d (N,emb_width,T) f32, commit_loss, metrics)."""
    N, width, T = x_nct.shape
    K, D = codebook.shape
    # TODO(synk): the width == 2*emb_width preprocess branch (x = x1 + x2) is
    # not implemented; only the standard width == emb_width path is supported.
    assert width == D, f"expected width == emb_width, got {width} vs {D}"
    M = N * T

    # NCT -> (M, D) row-major token layout (torch permute(0,2,1).view(-1, D))
    x_flat = jnp.transpose(x_nct, (0, 2, 1)).reshape(M, D).astype(jnp.float32)

    TM = min(row_tile, _round_up(M, 128))
    M_pad = _round_up(M, TM)
    Dp = _round_up(D, 128)
    Kp = _round_up(K, 128)

    x_p = jnp.zeros((M_pad, Dp), jnp.float32).at[:M, :D].set(x_flat)
    k_p = jnp.zeros((Kp, Dp), jnp.float32).at[:K, :D].set(
        codebook.astype(jnp.float32))
    kt_p = jnp.transpose(k_p)                                  # (Dp, Kp)
    k2_p = jnp.sum(k_p * k_p, axis=1).reshape(1, Kp)           # (1, Kp)

    n_tiles = M_pad // TM
    kernel = partial(_vq_bottleneck_kernel, k_bins=K)

    out_shapes = (
        jax.ShapeDtypeStruct((M_pad, Dp), jnp.float32),   # straight-through x_d
        jax.ShapeDtypeStruct((M_pad, 1), jnp.int32),      # codes
        jax.ShapeDtypeStruct((M_pad, 1), jnp.float32),    # min distance / row
        jax.ShapeDtypeStruct((M_pad, 1), jnp.float32),    # squared error / row
        jax.ShapeDtypeStruct((M_pad, 1), jnp.float32),    # sum(x) / row
        jax.ShapeDtypeStruct((M_pad, 1), jnp.float32),    # sum(x^2) / row
    )

    def row_spec():
        return pl.BlockSpec((TM, 1), lambda i: (i, 0))

    xd, codes, mind, sqerr, xsum, x2sum = pl.pallas_call(
        kernel,
        out_shape=out_shapes,
        grid_spec=pltpu.PrefetchScalarGridSpec(
            num_scalar_prefetch=0,
            grid=(n_tiles,),
            in_specs=[
                pl.BlockSpec((TM, Dp), lambda i: (i, 0)),   # x tile
                pl.BlockSpec((Kp, Dp), lambda i: (0, 0)),   # codebook (invariant)
                pl.BlockSpec((Dp, Kp), lambda i: (0, 0)),   # codebook^T (invariant)
                pl.BlockSpec((1, Kp), lambda i: (0, 0)),    # |k|^2 (invariant)
            ],
            out_specs=(
                pl.BlockSpec((TM, Dp), lambda i: (i, 0)),
                row_spec(), row_spec(), row_spec(), row_spec(), row_spec(),
            ),
        ),
        compiler_params=pltpu.CompilerParams(
            dimension_semantics=("parallel",)),
    )(x_p, k_p, kt_p, k2_p)

    # Slice off row/channel padding and finalise scalars (tiny wrapper reductions).
    x_l = codes[:M, 0].reshape(N, T)
    x_d = jnp.transpose(xd[:M, :D].reshape(N, T, D), (0, 2, 1))

    n = M * D
    fit = jnp.sum(mind[:M]) / M
    commit_loss = jnp.sum(sqerr[:M]) / n
    s1 = jnp.sum(xsum[:M])
    s2 = jnp.sum(x2sum[:M])
    prenorm = jnp.sqrt(jnp.maximum(s2 - s1 * s1 / n, 0.0)) / np.sqrt(n)

    # TODO(synk): init_k / update_k (randperm init, EMA codebook update with
    # dist.broadcast / dist.all_reduce) are distributed training-time ops and
    # are not implemented; the codebook is taken as given (eval semantics).
    return x_l, x_d, commit_loss, dict(fit=fit, pn=prenorm)


# ----------------------------------------------------------------------------
# Pure-JAX reference mirroring the PyTorch forward (eval path).
# ----------------------------------------------------------------------------
def bottleneck_forward_reference(x_nct, codebook):
    N, width, T = x_nct.shape
    K, D = codebook.shape
    x = jnp.transpose(x_nct, (0, 2, 1)).reshape(-1, D)
    n = x.size
    prenorm = jnp.linalg.norm(x - jnp.mean(x)) / np.sqrt(n)
    k_w = codebook.T
    dist = (jnp.sum(x * x, axis=-1, keepdims=True)
            - 2.0 * jnp.dot(x, k_w, precision=jax.lax.Precision.HIGHEST)
            + jnp.sum(k_w * k_w, axis=0, keepdims=True))
    x_l = jnp.argmin(dist, axis=-1)
    fit = jnp.mean(jnp.min(dist, axis=-1))
    x_d = codebook[x_l]
    commit_loss = jnp.sum((x_d - x) ** 2) / n
    x_st = x + (x_d - x)
    x_d_out = jnp.transpose(x_st.reshape(N, T, D), (0, 2, 1))
    return x_l.reshape(N, T).astype(jnp.int32), x_d_out, commit_loss, fit, prenorm


if __name__ == "__main__":
    # Small BottleneckBlock config: k_bins=64, emb_width=32; input (N=2, C=32, T=24)
    N, emb_width, T, k_bins = 2, 32, 24, 64

    key = jax.random.PRNGKey(0)
    kx, kk = jax.random.split(key)
    x = jax.random.normal(kx, (N, emb_width, T), jnp.float32)       # NCT layout
    codebook = jax.random.normal(kk, (k_bins, emb_width), jnp.float32)

    x_l, x_d, commit, metrics = bottleneck_forward(x, codebook)
    jax.block_until_ready((x_l, x_d, commit, metrics["fit"], metrics["pn"]))

    rx_l, rx_d, rcommit, rfit, rpn = bottleneck_forward_reference(x, codebook)

    np.testing.assert_array_equal(np.asarray(x_l), np.asarray(rx_l))
    np.testing.assert_allclose(np.asarray(x_d), np.asarray(rx_d),
                               rtol=1e-5, atol=1e-5)
    np.testing.assert_allclose(float(commit), float(rcommit), rtol=1e-4, atol=1e-5)
    np.testing.assert_allclose(float(metrics["fit"]), float(rfit),
                               rtol=1e-4, atol=1e-5)
    np.testing.assert_allclose(float(metrics["pn"]), float(rpn),
                               rtol=1e-4, atol=1e-5)

    print("KERNEL_OK")
</pallas_src>

<mosaic_0001>
module attributes {stable_mosaic.version = 11 : i64} {
  func.func @_vq_bottleneck_kernel(%arg0: i32, %arg1: memref<128x128xf32, #tpu.memory_space<vmem>>, %arg2: memref<128x128xf32, #tpu.memory_space<vmem>>, %arg3: memref<128x128xf32, #tpu.memory_space<vmem>>, %arg4: memref<1x128xf32, #tpu.memory_space<vmem>>, %arg5: memref<128x128xf32, #tpu.memory_space<vmem>>, %arg6: memref<128x1xi32, #tpu.memory_space<vmem>>, %arg7: memref<128x1xf32, #tpu.memory_space<vmem>>, %arg8: memref<128x1xf32, #tpu.memory_space<vmem>>, %arg9: memref<128x1xf32, #tpu.memory_space<vmem>>, %arg10: memref<128x1xf32, #tpu.memory_space<vmem>>) attributes {dimension_semantics = [#tpu.dimension_semantics<parallel>], iteration_bounds = array<i64: 1>, scalar_prefetch = 0 : i64, scratch_operands = 0 : i64, tpu.core_type = #tpu.core_type<tc>, window_params = [{transform_indices = @transform_0, window_bounds = array<i64: 128, 128>}, {pipeline_mode = #tpu.pipeline_mode<synchronous>, transform_indices = @transform_1, window_bounds = array<i64: 128, 128>}, {pipeline_mode = #tpu.pipeline_mode<synchronous>, transform_indices = @transform_2, window_bounds = array<i64: 128, 128>}, {pipeline_mode = #tpu.pipeline_mode<synchronous>, transform_indices = @transform_3, window_bounds = array<i64: 1, 128>}, {transform_indices = @transform_4, window_bounds = array<i64: 128, 128>}, {transform_indices = @transform_5, window_bounds = array<i64: 128, 1>}, {transform_indices = @transform_6, window_bounds = array<i64: 128, 1>}, {transform_indices = @transform_7, window_bounds = array<i64: 128, 1>}, {transform_indices = @transform_8, window_bounds = array<i64: 128, 1>}, {transform_indices = @transform_9, window_bounds = array<i64: 128, 1>}]} {
    %c0 = arith.constant 0 : index
    %c0_0 = arith.constant 0 : index
    %0 = vector.load %arg1[%c0, %c0_0] : memref<128x128xf32, #tpu.memory_space<vmem>>, vector<128x128xf32>
    %c0_1 = arith.constant 0 : index
    %c0_2 = arith.constant 0 : index
    %1 = vector.load %arg3[%c0_1, %c0_2] : memref<128x128xf32, #tpu.memory_space<vmem>>, vector<128x128xf32>
    %c0_3 = arith.constant 0 : index
    %c0_4 = arith.constant 0 : index
    %2 = vector.load %arg4[%c0_3, %c0_4] : memref<1x128xf32, #tpu.memory_space<vmem>>, vector<1x128xf32>
    %3 = arith.mulf %0, %0 : vector<128x128xf32>
    %cst = arith.constant dense<0.000000e+00> : vector<128xf32>
    %4 = vector.multi_reduction <add>, %3, %cst [1] : vector<128x128xf32> to vector<128xf32>
    %5 = vector.shape_cast %4 : vector<128xf32> to vector<128x1xf32>
    %cst_5 = arith.constant dense<0.000000e+00> : vector<128x128xf32>
    %6 = tpu.matmul %0, %1, %cst_5 {dimension_numbers = #tpu.dot_dimension_numbers<[1], [0], [0], [1], [0, 0, 1, 1], [], []>} : vector<128x128xf32>, vector<128x128xf32>, vector<128x128xf32> -> vector<128x128xf32>
    %cst_6 = arith.constant 2.000000e+00 : f32
    %7 = vector.broadcast %cst_6 : f32 to vector<128x128xf32>
    %8 = arith.mulf %7, %6 : vector<128x128xf32>
    %9 = vector.broadcast %5 : vector<128x1xf32> to vector<128x128xf32>
    %10 = arith.subf %9, %8 : vector<128x128xf32>
    %11 = vector.broadcast %2 : vector<1x128xf32> to vector<128x128xf32>
    %12 = arith.addf %10, %11 : vector<128x128xf32>
    %13 = tpu.iota {dimensions = array<i32: 1>} : vector<128x128xi32>
    %c64_i32 = arith.constant 64 : i32
    %14 = vector.broadcast %c64_i32 : i32 to vector<128x128xi32>
    %15 = arith.cmpi slt, %13, %14 : vector<128x128xi32>
    %cst_7 = arith.constant 0x7F800000 : f32
    %16 = vector.broadcast %cst_7 : f32 to vector<128x128xf32>
    %17 = arith.select %15, %12, %16 : vector<128x128xi1>, vector<128x128xf32>
    %cst_8 = arith.constant dense<0x7F800000> : vector<128xf32>
    %18 = vector.multi_reduction <minimumf>, %17, %cst_8 [1] : vector<128x128xf32> to vector<128xf32>
    %19 = vector.shape_cast %18 : vector<128xf32> to vector<128x1xf32>
    %20 = vector.broadcast %19 : vector<128x1xf32> to vector<128x128xf32>
    %21 = arith.cmpf oeq, %17, %20 : vector<128x128xf32>
    %c128_i32 = arith.constant 128 : i32
    %22 = vector.broadcast %c128_i32 : i32 to vector<128x128xi32>
    %23 = arith.select %21, %13, %22 : vector<128x128xi1>, vector<128x128xi32>
    %cst_9 = arith.constant dense<2147483647> : vector<128xi32>
    %24 = vector.multi_reduction <minsi>, %23, %cst_9 [1] : vector<128x128xi32> to vector<128xi32>
    %25 = vector.shape_cast %24 : vector<128xi32> to vector<128x1xi32>
    %26 = vector.broadcast %25 : vector<128x1xi32> to vector<128x128xi32>
    %27 = arith.cmpi eq, %13, %26 : vector<128x128xi32>
    %28 = arith.extui %27 : vector<128x128xi1> to vector<128x128xi32>
    %29 = arith.sitofp %28 : vector<128x128xi32> to vector<128x128xf32>
    %c0_10 = arith.constant 0 : index
    %c0_11 = arith.constant 0 : index
    %30 = vector.load %arg2[%c0_10, %c0_11] : memref<128x128xf32, #tpu.memory_space<vmem>>, vector<128x128xf32>
    %cst_12 = arith.constant dense<0.000000e+00> : vector<128x128xf32>
    %31 = tpu.matmul %29, %30, %cst_12 {dimension_numbers = #tpu.dot_dimension_numbers<[1], [0], [0], [1], [0, 0, 1, 1], [], []>} : vector<128x128xf32>, vector<128x128xf32>, vector<128x128xf32> -> vector<128x128xf32>
    %32 = arith.subf %31, %0 : vector<128x128xf32>
    %33 = arith.addf %0, %32 : vector<128x128xf32>
    %c0_13 = arith.constant 0 : index
    %c0_14 = arith.constant 0 : index
    %34 = vector.load %arg5[%c0_13, %c0_14] : memref<128x128xf32, #tpu.memory_space<vmem>>, vector<128x128xf32>
    tpu.vector_store %arg5[%c0_13, %c0_14], %33 {strides = array<i32>} : memref<128x128xf32, #tpu.memory_space<vmem>>, vector<128x128xf32>,
    %c0_15 = arith.constant 0 : index
    %c0_16 = arith.constant 0 : index
    %35 = vector.load %arg6[%c0_15, %c0_16] : memref<128x1xi32, #tpu.memory_space<vmem>>, vector<128x1xi32>
    tpu.vector_store %arg6[%c0_15, %c0_16], %25 {strides = array<i32>} : memref<128x1xi32, #tpu.memory_space<vmem>>, vector<128x1xi32>,
    %c0_17 = arith.constant 0 : index
    %c0_18 = arith.constant 0 : index
    %36 = vector.load %arg7[%c0_17, %c0_18] : memref<128x1xf32, #tpu.memory_space<vmem>>, vector<128x1xf32>
    tpu.vector_store %arg7[%c0_17, %c0_18], %19 {strides = array<i32>} : memref<128x1xf32, #tpu.memory_space<vmem>>, vector<128x1xf32>,
    %37 = arith.mulf %32, %32 : vector<128x128xf32>
    %cst_19 = arith.constant dense<0.000000e+00> : vector<128xf32>
    %38 = vector.multi_reduction <add>, %37, %cst_19 [1] : vector<128x128xf32> to vector<128xf32>
    %39 = vector.shape_cast %38 : vector<128xf32> to vector<128x1xf32>
    %c0_20 = arith.constant 0 : index
    %c0_21 = arith.constant 0 : index
    %40 = vector.load %arg8[%c0_20, %c0_21] : memref<128x1xf32, #tpu.memory_space<vmem>>, vector<128x1xf32>
    tpu.vector_store %arg8[%c0_20, %c0_21], %39 {strides = array<i32>} : memref<128x1xf32, #tpu.memory_space<vmem>>, vector<128x1xf32>,
    %cst_22 = arith.constant dense<0.000000e+00> : vector<128xf32>
    %41 = vector.multi_reduction <add>, %0, %cst_22 [1] : vector<128x128xf32> to vector<128xf32>
    %42 = vector.shape_cast %41 : vector<128xf32> to vector<128x1xf32>
    %c0_23 = arith.constant 0 : index
    %c0_24 = arith.constant 0 : index
    %43 = vector.load %arg9[%c0_23, %c0_24] : memref<128x1xf32, #tpu.memory_space<vmem>>, vector<128x1xf32>
    tpu.vector_store %arg9[%c0_23, %c0_24], %42 {strides = array<i32>} : memref<128x1xf32, #tpu.memory_space<vmem>>, vector<128x1xf32>,
    %c0_25 = arith.constant 0 : index
    %c0_26 = arith.constant 0 : index
    %44 = vector.load %arg10[%c0_25, %c0_26] : memref<128x1xf32, #tpu.memory_space<vmem>>, vector<128x1xf32>
    tpu.vector_store %arg10[%c0_25, %c0_26], %5 {strides = array<i32>} : memref<128x1xf32, #tpu.memory_space<vmem>>, vector<128x1xf32>,
    return
  }
  func.func @transform_0(%arg0: i32) -> (i32, i32) {
    %c0_i32 = arith.constant 0 : i32
    %c0_i32_0 = arith.constant 0 : i32
    return %arg0, %c0_i32 : i32, i32
  }
  func.func @transform_1(%arg0: i32) -> (i32, i32) {
    %c0_i32 = arith.constant 0 : i32
    %c0_i32_0 = arith.constant 0 : i32
    %c0_i32_1 = arith.constant 0 : i32
    return %c0_i32, %c0_i32_0 : i32, i32
  }
  func.func @transform_2(%arg0: i32) -> (i32, i32) {
    %c0_i32 = arith.constant 0 : i32
    %c0_i32_0 = arith.constant 0 : i32
    %c0_i32_1 = arith.constant 0 : i32
    return %c0_i32, %c0_i32_0 : i32, i32
  }
  func.func @transform_3(%arg0: i32) -> (i32, i32) {
    %c0_i32 = arith.constant 0 : i32
    %c0_i32_0 = arith.constant 0 : i32
    %c0_i32_1 = arith.constant 0 : i32
    return %c0_i32, %c0_i32_0 : i32, i32
  }
  func.func @transform_4(%arg0: i32) -> (i32, i32) {
    %c0_i32 = arith.constant 0 : i32
    %c0_i32_0 = arith.constant 0 : i32
    return %arg0, %c0_i32 : i32, i32
  }
  func.func @transform_5(%arg0: i32) -> (i32, i32) {
    %c0_i32 = arith.constant 0 : i32
    %c0_i32_0 = arith.constant 0 : i32
    return %arg0, %c0_i32 : i32, i32
  }
  func.func @transform_6(%arg0: i32) -> (i32, i32) {
    %c0_i32 = arith.constant 0 : i32
    %c0_i32_0 = arith.constant 0 : i32
    return %arg0, %c0_i32 : i32, i32
  }
  func.func @transform_7(%arg0: i32) -> (i32, i32) {
    %c0_i32 = arith.constant 0 : i32
    %c0_i32_0 = arith.constant 0 : i32
    return %arg0, %c0_i32 : i32, i32
  }
  func.func @transform_8(%arg0: i32) -> (i32, i32) {
    %c0_i32 = arith.constant 0 : i32
    %c0_i32_0 = arith.constant 0 : i32
    return %arg0, %c0_i32 : i32, i32
  }
  func.func @transform_9(%arg0: i32) -> (i32, i32) {
    %c0_i32 = arith.constant 0 : i32
    %c0_i32_0 = arith.constant 0 : i32
    return %arg0, %c0_i32 : i32, i32
  }
}

</mosaic_0001>

<bundles_post_ra>
// kernel: tpu_custom_call.1
= control target key start
LH: loop header
LB: loop body
LE: loop exit
PB: predicated region body
PF: predicated region fallthrough
CT: control target
= control target key end

     0   :  { %15 = vsyncpa [#allocation3], 0  ;;  %s2315_s0 = inlined_call_operand.hbm [shape: f32[128,128], index: 0, kind: input, shape index: {}]   ;;  %s2316_s1 = inlined_call_operand.hbm [shape: f32[128,128], index: 1, kind: input, shape index: {}]   ;;  %s2317_s2 = inlined_call_operand.hbm [shape: f32[128,128], index: 2, kind: input, shape index: {}]   ;;  %s2318_s3 = inlined_call_operand.vmem [shape: f32[1,128], index: 3, kind: input, shape index: {}]   ;;  %s2319_s4 = inlined_call_operand.hbm [shape: f32[128,128], index: 4, kind: output, shape index: {0}]   ;;  %s2320_s5 = inlined_call_operand.vmem [shape: s32[128,1], index: 5, kind: output, shape index: {1}]   ;;  %s2321_s6 = inlined_call_operand.vmem [shape: f32[128,1], index: 6, kind: output, shape index: {2}]   ;;  %s2322_s7 = inlined_call_operand.vmem [shape: f32[128,1], index: 7, kind: output, shape index: {3}]   ;;  %s2323_s8 = inlined_call_operand.vmem [shape: f32[128,1], index: 8, kind: output, shape index: {4}]   ;;  %s2324_s9 = inlined_call_operand.vmem [shape: f32[128,1], index: 9, kind: output, shape index: {5}]  }
   0x1   :  { %16 = vsyncpa [#allocation6], 0 }
   0x2   :  { %17 = vsyncpa [#allocation4], 0  ;;  %s1426_s30 = smov [#allocation5]   ;;  %s1427_s11 = smov [#allocation2]  }
   0x3   :  { %s35_s10 = sshll.u32 %s1426_s30, 4  ;;  %s23_s12 = sshll.u32 %s1427_s11, 4  ;;  %s36_s10 = int_to_ptr.vmem [resolvable:$true] %s35_s10  ;;  %s24_s12 = int_to_ptr.vmem [resolvable:$true] %s23_s12 }
   0x4   :  { %s1348_s13 = scalar_lea.vmem %s36_s10, 2048  ;;  %p1353_p1 = scmp.lt.s32.totalorder %s36_s10, %s36_s10 }
   0x5   :  { %p1349_p0 = scmp.ne.s32.totalorder %s36_s10, %s1348_s13  ;;  %p1354_p2 = scmp.lt.s32.totalorder %s1348_s13, %s1348_s13 }
   0x7   :  { %p1355_p3 = por %p1354_p2, %p1353_p1 }
   0x9   :  { %p1356_p4 = pnand %p1355_p3, %p1349_p0 }
   0xb   :  { %1359 = shalt.err (!%p1356_p4)
}
   0xc   :  { %s1428_s14 = smov 128   ;;  %s1429_s15 = smov 8  }
   0xd   :  { %41 = dma.hbm_to_vmem [thread:$0]  %s2316_s1, 2048, %s36_s10, [#allocation6], %s1428_s14, %s1428_s14, %s1429_s15  }
   0xe   :  { %s1368_s18 = scalar_lea.vmem %s24_s12, 2048  ;;  %p1373_p6 = scmp.lt.s32.totalorder %s24_s12, %s24_s12 }
   0xf   :  { %p1369_p5 = scmp.ne.s32.totalorder %s24_s12, %s1368_s18  ;;  %p1374_p7 = scmp.lt.s32.totalorder %s1368_s18, %s1368_s18 }
  0x11   :  { %p1375_p8 = por %p1374_p7, %p1373_p6 }
  0x13   :  { %p1376_p9 = pnand %p1375_p8, %p1369_p5 }
  0x15   :  { %1379 = shalt.err (!%p1376_p9)
}
  0x16   :  { %29 = dma.hbm_to_vmem [thread:$0]  %s2315_s0, 2048, %s24_s12, [#allocation3], %s1428_s14, %s1428_s14, %s1429_s15  }
  0x17   :  { %s1430_s21 = smov [#allocation7]  }
  0x18   :  { %s47_s22 = sshll.u32 %s1430_s21, 4  ;;  %s48_s22 = int_to_ptr.vmem [resolvable:$true] %s47_s22 }
  0x19   :  { %s1388_s23 = scalar_lea.vmem %s48_s22, 2048  ;;  %p1393_p11 = scmp.lt.s32.totalorder %s48_s22, %s48_s22 }
  0x1a   :  { %p1389_p10 = scmp.ne.s32.totalorder %s48_s22, %s1388_s23  ;;  %p1394_p12 = scmp.lt.s32.totalorder %s1388_s23, %s1388_s23 }
  0x1c   :  { %p1395_p13 = por %p1394_p12, %p1393_p11 }
  0x1e   :  { %p1396_p0 = pnand %p1395_p13, %p1389_p10 }
  0x20   :  { %1399 = shalt.err (!%p1396_p0)
}
  0x21   :  { %53 = dma.hbm_to_vmem [thread:$0]  %s2317_s2, 2048, %s48_s22, [#allocation6], %s1428_s14, %s1428_s14, %s1429_s15  }
  0x22   :  { %1420 = dma.done.wait [#allocation3], 2048  }
  0x23   :  { %1421 = vsyncadd [#allocation3], 4294965248 }
  0x24   :  { %1422 = dma.done.wait [#allocation6], 4096  }
  0x25   :  { %1423 = vsyncadd [#allocation6], 4294963200  ;;  %v96_v0 = vld [vmem:[#allocation7 + $0x78] sm:$0xff]  ;;  %v95_v1 = vld [vmem:[#allocation7 + $0x70] sm:$0xff]  ;;  %vm909_vm0 = vcmask 7168   ;;  %s1432_s27 = smov [#allocation8]  }
  0x26   :  { %1205 = vmatprep.subr.mxu0 %v96_v0  ;;  %v94_v2 = vld [vmem:[#allocation7 + $0x68] sm:$0xff]  ;;  %v93_v3 = vld [vmem:[#allocation7 + $0x60] sm:$0xff]  ;;  %v92_v5 = vld [vmem:[#allocation7 + $0x58] sm:$0xff]  ;;  %s1075_s28 = sshll.u32 %s1432_s27, 4  ;;  %s1076_s28 = int_to_ptr.vmem [resolvable:$true] %s1075_s28 }
  0x27   :  { %1206 = vmatpush3.msra.mxu0 %v96_v0  ;;  %v1501_v4 = vld [vmem:[#allocation2] sm:$0xff]  ;;  %v1504_v6 = vld [vmem:[#allocation2 + $0x10] sm:$0xff]  ;;  %v1508_v8 = vld [vmem:[#allocation2 + $0x8] sm:$0xff]  ;;  %v345_v0 = vlaneseq  ;;  %p1405_p2 = scmp.lt.s32.totalorder %s1076_s28, %s1076_s28 }
  0x28   :  { %1207 = vmatprep.subr.mxu0 %v95_v1  ;;  %1237 = vmatprep.mubr.f32.mxu0 %v1501_v4  ;;  %v98_v7 = vmul.f32 %v1501_v4, %v1501_v4  ;;  %v100_v9 = vmul.f32 %v1504_v6, %v1504_v6  ;;  %v91_v10 = vld [vmem:[#allocation7 + $0x50] sm:$0xff]  ;;  %v1512_v11 = vld [vmem:[#allocation2 + $0x18] sm:$0xff]  ;;  %v99_v12 = vmul.f32 %v1508_v8, %v1508_v8  ;;  %v90_v14 = vld [vmem:[#allocation7 + $0x48] sm:$0xff] }
  0x29   :  { %1208 = vmatpush3.msra.mxu0 %v95_v1  ;;  %v101_v13 = vmul.f32 %v1512_v11, %v1512_v11  ;;  %v1518_v15 = vld [vmem:[#allocation2 + $0x20] sm:$0xff]  ;;  %v1520_v17 = vld [vmem:[#allocation2 + $0x28] sm:$0xff]  ;;  %v88_v20 = vld [vmem:[#allocation7 + $0x38] sm:$0xff] }
  0x2a   :  { %1209 = vmatprep.subr.mxu0 %v94_v2  ;;  %114 = vadd.xlane.f32.xlu0 %v98_v7  ;;  %v89_v16 = vld [vmem:[#allocation7 + $0x40] sm:$0xff]  ;;  %v102_v18 = vmul.f32 %v1518_v15, %v1518_v15  ;;  %v103_v19 = vmul.f32 %v1520_v17, %v1520_v17  ;;  %v1526_v21 = vld [vmem:[#allocation2 + $0x30] sm:$0xff]  ;;  %v1528_v23 = vld [vmem:[#allocation2 + $0x38] sm:$0xff] }
  0x2b   :  { %1210 = vmatpush3.msra.mxu0 %v94_v2  ;;  %118 = vadd.xlane.f32.xlu1 %v100_v9  ;;  %v87_v22 = vld [vmem:[#allocation7 + $0x30] sm:$0xff]  ;;  %v104_v24 = vmul.f32 %v1526_v21, %v1526_v21  ;;  %v105_v25 = vmul.f32 %v1528_v23, %v1528_v23  ;;  %v86_v26 = vld [vmem:[#allocation7 + $0x28] sm:$0xff]  ;;  %v1534_v27 = vld [vmem:[#allocation2 + $0x40] sm:$0xff]  ;;  %v1668_v2 = vand.u32 127, %v345_v0 }
  0x2c   :  { %1211 = vmatprep.subr.mxu0 %v93_v3  ;;  %v85_v28 = vld [vmem:[#allocation7 + $0x20] sm:$0xff]  ;;  %v1536_v29 = vld [vmem:[#allocation2 + $0x48] sm:$0xff]  ;;  %v106_v30 = vmul.f32 %v1534_v27, %v1534_v27  ;;  %v84_v32 = vld [vmem:[#allocation7 + $0x18] sm:$0xff] }
  0x2d   :  { %1212 = vmatpush3.msra.mxu0 %v93_v3  ;;  %v107_v31 = vmul.f32 %v1536_v29, %v1536_v29  ;;  %v1542_v33 = vld [vmem:[#allocation2 + $0x50] sm:$0xff]  ;;  %v1544_v35 = vld [vmem:[#allocation2 + $0x58] sm:$0xff]  ;;  %v82_v38 = vld [vmem:[#allocation7 + $0x8] sm:$0xff]  ;;  %vm347_vm1 = vcmp.lt.s32.totalorder %v1668_v2, 64 }
  0x2e   :  { %1213 = vmatprep.subr.mxu0 %v92_v5  ;;  %116 = vadd.xlane.f32.xlu0 %v99_v12  ;;  %v83_v34 = vld [vmem:[#allocation7 + $0x10] sm:$0xff]  ;;  %v108_v36 = vmul.f32 %v1542_v33, %v1542_v33  ;;  %v109_v37 = vmul.f32 %v1544_v35, %v1544_v35  ;;  %v1550_v39 = vld [vmem:[#allocation2 + $0x60] sm:$0xff]  ;;  %v1552_v41 = vld [vmem:[#allocation2 + $0x68] sm:$0xff] }
  0x2f   :  { %1214 = vmatpush3.msra.mxu0 %v92_v5  ;;  %120 = vadd.xlane.f32.xlu1 %v101_v13  ;;  %v81_v40 = vld [vmem:[#allocation7] sm:$0xff]  ;;  %v110_v42 = vmul.f32 %v1550_v39, %v1550_v39  ;;  %v111_v43 = vmul.f32 %v1552_v41, %v1552_v41  ;;  %v79_v44 = vld [vmem:[#allocation2 + $0x70] sm:$0xff]  ;;  %v80_v45 = vld [vmem:[#allocation2 + $0x78] sm:$0xff] }
  0x30   :  { %1215 = vmatprep.subr.mxu0 %v91_v10  ;;  %v112_v46 = vmul.f32 %v79_v44, %v79_v44  ;;  %v113_v47 = vmul.f32 %v80_v45, %v80_v45  ;;  %v1673_v7 = vld [vmem:[%s2318_s3] ss:$0 sm:$0xff] }
  0x31   :  { %1216 = vmatpush3.msra.mxu0 %v91_v10 }
  0x32   :  { %1217 = vmatprep.subr.mxu0 %v90_v14  ;;  %122 = vadd.xlane.f32.xlu0 %v102_v18 }
  0x33   :  { %1218 = vmatpush3.msra.mxu0 %v90_v14  ;;  %124 = vadd.xlane.f32.xlu1 %v103_v19 }
  0x34   :  { %1219 = vmatprep.subr.mxu0 %v89_v16 }
  0x35   :  { %1220 = vmatpush3.msra.mxu0 %v89_v16 }
  0x36   :  { %1221 = vmatprep.subr.mxu0 %v88_v20  ;;  %126 = vadd.xlane.f32.xlu0 %v104_v24 }
  0x37   :  { %1222 = vmatpush3.msra.mxu0 %v88_v20  ;;  %128 = vadd.xlane.f32.xlu1 %v105_v25 }
  0x38   :  { %1223 = vmatprep.subr.mxu0 %v87_v22 }
  0x39   :  { %1224 = vmatpush3.msra.mxu0 %v87_v22 }
  0x3a   :  { %1225 = vmatprep.subr.mxu0 %v86_v26  ;;  %130 = vadd.xlane.f32.xlu0 %v106_v30 }
  0x3b   :  { %1226 = vmatpush3.msra.mxu0 %v86_v26  ;;  %132 = vadd.xlane.f32.xlu1 %v107_v31 }
  0x3c   :  { %1227 = vmatprep.subr.mxu0 %v85_v28 }
  0x3d   :  { %1228 = vmatpush3.msra.mxu0 %v85_v28 }
  0x3e   :  { %1229 = vmatprep.subr.mxu0 %v84_v32  ;;  %134 = vadd.xlane.f32.xlu0 %v108_v36 }
  0x3f   :  { %1230 = vmatpush3.msra.mxu0 %v84_v32  ;;  %136 = vadd.xlane.f32.xlu1 %v109_v37 }
  0x40   :  { %1231 = vmatprep.subr.mxu0 %v83_v34 }
  0x41   :  { %1232 = vmatpush3.msra.mxu0 %v83_v34 }
  0x42   :  { %1233 = vmatprep.subr.mxu0 %v82_v38  ;;  %138 = vadd.xlane.f32.xlu0 %v110_v42 }
  0x43   :  { %1234 = vmatpush3.msra.mxu0 %v82_v38  ;;  %140 = vadd.xlane.f32.xlu1 %v111_v43 }
  0x44   :  { %1235 = vmatprep.subr.mxu0 %v81_v40 }
  0x45   :  { %1236 = vmatpush3.msra.mxu0 %v81_v40 }
  0x46   :  { %1238 = vmatmul.mubr.f32.vlgmr.msra.gmra.mxu0 %v1508_v8  ;;  %142 = vadd.xlane.f32.xlu0 %v112_v46 }
  0x47   :  { %1240 = vmatprep.mubr.f32.mxu0 %v1504_v6  ;;  %144 = vadd.xlane.f32.xlu1 %v113_v47 }
  0x4a   :  { %1241 = vmatmul.mubr.f32.gmra.mxu0 %v1512_v11 }
  0x4b   :  { %1243 = vmatprep.mubr.f32.mxu0 %v1518_v15 }
  0x4e   :  { %1244 = vmatmul.mubr.f32.gmra.mxu0 %v1520_v17 }
  0x4f   :  { %1246 = vmatprep.mubr.f32.mxu0 %v1526_v21 }
  0x52   :  { %1247 = vmatmul.mubr.f32.gmra.mxu0 %v1528_v23 }
  0x53   :  { %1249 = vmatprep.mubr.f32.mxu0 %v1534_v27 }
  0x56   :  { %1250 = vmatmul.mubr.f32.gmra.mxu0 %v1536_v29 }
  0x57   :  { %1252 = vmatprep.mubr.f32.mxu0 %v1542_v33 }
  0x5a   :  { %1253 = vmatmul.mubr.f32.gmra.mxu0 %v1544_v35 }
  0x5b   :  { %1255 = vmatprep.mubr.f32.mxu0 %v1550_v39 }
  0x5e   :  { %1256 = vmatmul.mubr.f32.gmra.mxu0 %v1552_v41 }
  0x5f   :  { %1258 = vmatprep.mubr.f32.mxu0 %v79_v44 }
  0x62   :  { %1259 = vmatmul.mubr.f32.gmra.mxu0 %v80_v45 }
  0xb3   :  { %v115_v48 = vpop.xlane.xlu0 %114 }
  0xb4   :  { %1054 = vst.msk [vmem:[%s2324_s9] sm:$0xff] %vm909_vm0, %v115_v48  ;;  %v119_v49 = vpop.xlane.xlu1 %118 }
  0xb5   :  { %1056 = vst.msk [vmem:[%s2324_s9 + $0x10] sm:$0xff] %vm909_vm0, %v119_v49 }
  0xb7   :  { %v117_v50 = vpop.xlane.xlu0 %116 }
  0xb8   :  { %1055 = vst.msk [vmem:[%s2324_s9 + $0x8] sm:$0xff] %vm909_vm0, %v117_v50  ;;  %v121_v51 = vpop.xlane.xlu1 %120 }
  0xb9   :  { %1057 = vst.msk [vmem:[%s2324_s9 + $0x18] sm:$0xff] %vm909_vm0, %v121_v51 }
  0xbb   :  { %v1587_v52 = vpop.xlane.xlu0 %122 }
  0xbc   :  { %v125_v53 = vpop.xlane.xlu1 %124  ;;  %1058 = vst.msk [vmem:[%s2324_s9 + $0x20] sm:$0xff] %vm909_vm0, %v1587_v52 }
  0xbd   :  { %1059 = vst.msk [vmem:[%s2324_s9 + $0x28] sm:$0xff] %vm909_vm0, %v125_v53 }
  0xbf   :  { %v1598_v54 = vpop.xlane.xlu0 %126 }
  0xc0   :  { %v1600_v55 = vpop.xlane.xlu1 %128  ;;  %1060 = vst.msk [vmem:[%s2324_s9 + $0x30] sm:$0xff] %vm909_vm0, %v1598_v54 }
  0xc1   :  { %1061 = vst.msk [vmem:[%s2324_s9 + $0x38] sm:$0xff] %vm909_vm0, %v1600_v55 }
  0xc3   :  { %v1612_v56 = vpop.xlane.xlu0 %130 }
  0xc4   :  { %v1614_v57 = vpop.xlane.xlu1 %132  ;;  %1062 = vst.msk [vmem:[%s2324_s9 + $0x40] sm:$0xff] %vm909_vm0, %v1612_v56 }
  0xc5   :  { %1063 = vst.msk [vmem:[%s2324_s9 + $0x48] sm:$0xff] %vm909_vm0, %v1614_v57 }
  0xc7   :  { %v1626_v58 = vpop.xlane.xlu0 %134 }
  0xc8   :  { %v1628_v59 = vpop.xlane.xlu1 %136  ;;  %1064 = vst.msk [vmem:[%s2324_s9 + $0x50] sm:$0xff] %vm909_vm0, %v1626_v58 }
  0xc9   :  { %1065 = vst.msk [vmem:[%s2324_s9 + $0x58] sm:$0xff] %vm909_vm0, %v1628_v59 }
  0xcb   :  { %v1640_v60 = vpop.xlane.xlu0 %138 }
  0xcc   :  { %v1642_v61 = vpop.xlane.xlu1 %140  ;;  %1066 = vst.msk [vmem:[%s2324_s9 + $0x60] sm:$0xff] %vm909_vm0, %v1640_v60 }
  0xcd   :  { %1067 = vst.msk [vmem:[%s2324_s9 + $0x68] sm:$0xff] %vm909_vm0, %v1642_v61 }
  0xcf   :  { %v1654_v62 = vpop.xlane.xlu0 %142 }
  0xd0   :  { %v1656_v63 = vpop.xlane.xlu1 %144  ;;  %1068 = vst.msk [vmem:[%s2324_s9 + $0x70] sm:$0xff] %vm909_vm0, %v1654_v62 }
  0xd1   :  { %1069 = vst.msk [vmem:[%s2324_s9 + $0x78] sm:$0xff] %vm909_vm0, %v1656_v63 }
 0x106   :  { %v1239_v1 = vpop.f32.mrf.mxu0 }
 0x107   :  { %v292_v3 = vmul.f32 2.0, %v1239_v1 }
 0x108   :  { %v212_v5 = vpop.f32.mrf.mxu0 }
 0x109   :  { %v291_v9 = vmul.f32 2.0, %v212_v5  ;;  %v308_v10 = vsub.f32 %v117_v50, %v292_v3 }
 0x10a   :  { %v1242_v12 = vpop.f32.mrf.mxu0 }
 0x10b   :  { %v307_v13 = vsub.f32 %v115_v48, %v291_v9  ;;  %v294_v14 = vmul.f32 2.0, %v1242_v12  ;;  %v330_v16 = vadd.f32 %v1673_v7, %v308_v10 }
 0x10c   :  { %v222_v18 = vpop.f32.mrf.mxu0 }
 0x10d   :  { %v310_v19 = vsub.f32 %v121_v51, %v294_v14  ;;  %v293_v20 = vmul.f32 2.0, %v222_v18  ;;  %v1679_v22 = vsel %vm347_vm1, %v330_v16, inf  ;;  %v329_v24 = vadd.f32 %v1673_v7, %v307_v13 }
 0x10e   :  { %v1245_v25 = vpop.f32.mrf.mxu0  ;;  %366 = vmin.xlane.f32.xlu1 %v1679_v22 }
 0x10f   :  { %v309_v26 = vsub.f32 %v119_v49, %v293_v20  ;;  %v296_v28 = vmul.f32 2.0, %v1245_v25  ;;  %v1685_v30 = vsel %vm347_vm1, %v329_v24, inf  ;;  %v332_v31 = vadd.f32 %v1673_v7, %v310_v19 }
 0x110   :  { %v232_v32 = vpop.f32.mrf.mxu0  ;;  %364 = vmin.xlane.f32.xlu0 %v1685_v30 }
 0x111   :  { %v312_v34 = vsub.f32 %v125_v53, %v296_v28  ;;  %v295_v36 = vmul.f32 2.0, %v232_v32  ;;  %v1691_v37 = vsel %vm347_vm1, %v332_v31, inf  ;;  %v331_v38 = vadd.f32 %v1673_v7, %v309_v26 }
 0x112   :  { %v1248_v40 = vpop.f32.mrf.mxu0  ;;  %370 = vmin.xlane.f32.xlu1 %v1691_v37 }
 0x113   :  { %v298_v42 = vmul.f32 2.0, %v1248_v40  ;;  %v311_v43 = vsub.f32 %v1587_v52, %v295_v36  ;;  %v1698_v44 = vsel %vm347_vm1, %v331_v38, inf  ;;  %v334_v45 = vadd.f32 %v1673_v7, %v312_v34 }
 0x114   :  { %v242_v46 = vpop.f32.mrf.mxu0  ;;  %368 = vmin.xlane.f32.xlu0 %v1698_v44 }
 0x115   :  { %v314_v47 = vsub.f32 %v1600_v55, %v298_v42  ;;  %v297_v48 = vmul.f32 2.0, %v242_v46  ;;  %v1705_v49 = vsel %vm347_vm1, %v334_v45, inf  ;;  %v333_v50 = vadd.f32 %v1673_v7, %v311_v43 }
 0x116   :  { %v1251_v51 = vpop.f32.mrf.mxu0  ;;  %374 = vmin.xlane.f32.xlu1 %v1705_v49 }
 0x117   :  { %v300_v52 = vmul.f32 2.0, %v1251_v51  ;;  %v313_v53 = vsub.f32 %v1598_v54, %v297_v48  ;;  %v1712_v0 = vsel %vm347_vm1, %v333_v50, inf  ;;  %v336_v1 = vadd.f32 %v1673_v7, %v314_v47 }
 0x118   :  { %v252_v55 = vpop.f32.mrf.mxu0  ;;  %372 = vmin.xlane.f32.xlu0 %v1712_v0 }
 0x119   :  { %v316_v3 = vsub.f32 %v1614_v57, %v300_v52  ;;  %v299_v5 = vmul.f32 2.0, %v252_v55  ;;  %v1719_v9 = vsel %vm347_vm1, %v336_v1, inf  ;;  %v335_v10 = vadd.f32 %v1673_v7, %v313_v53 }
 0x11a   :  { %v1254_v12 = vpop.f32.mrf.mxu0  ;;  %378 = vmin.xlane.f32.xlu1 %v1719_v9 }
 0x11b   :  { %v302_v54 = vmul.f32 2.0, %v1254_v12  ;;  %v315_v13 = vsub.f32 %v1612_v56, %v299_v5  ;;  %v1726_v14 = vsel %vm347_vm1, %v335_v10, inf  ;;  %v338_v16 = vadd.f32 %v1673_v7, %v316_v3 }
 0x11c   :  { %v262_v57 = vpop.f32.mrf.mxu0  ;;  %376 = vmin.xlane.f32.xlu0 %v1726_v14 }
 0x11d   :  { %v318_v18 = vsub.f32 %v1628_v59, %v302_v54  ;;  %v301_v19 = vmul.f32 2.0, %v262_v57  ;;  %v1733_v20 = vsel %vm347_vm1, %v338_v16, inf  ;;  %v337_v24 = vadd.f32 %v1673_v7, %v315_v13 }
 0x11e   :  { %v1257_v25 = vpop.f32.mrf.mxu0  ;;  %382 = vmin.xlane.f32.xlu1 %v1733_v20 }
 0x11f   :  { %v304_v56 = vmul.f32 2.0, %v1257_v25  ;;  %v317_v26 = vsub.f32 %v1626_v58, %v301_v19  ;;  %v1740_v28 = vsel %vm347_vm1, %v337_v24, inf  ;;  %v340_v31 = vadd.f32 %v1673_v7, %v318_v18 }
 0x120   :  { %v272_v59 = vpop.f32.mrf.mxu0  ;;  %380 = vmin.xlane.f32.xlu0 %v1740_v28 }
 0x121   :  { %v320_v32 = vsub.f32 %v1642_v61, %v304_v56  ;;  %v303_v34 = vmul.f32 2.0, %v272_v59  ;;  %v1747_v36 = vsel %vm347_vm1, %v340_v31, inf  ;;  %v339_v38 = vadd.f32 %v1673_v7, %v317_v26 }
 0x122   :  { %v1260_v40 = vpop.f32.mrf.mxu0  ;;  %386 = vmin.xlane.f32.xlu1 %v1747_v36 }
 0x123   :  { %v306_v58 = vmul.f32 2.0, %v1260_v40  ;;  %v319_v42 = vsub.f32 %v1640_v60, %v303_v34  ;;  %v1754_v43 = vsel %vm347_vm1, %v339_v38, inf  ;;  %v342_v45 = vadd.f32 %v1673_v7, %v320_v32 }
 0x124   :  { %v282_v61 = vpop.f32.mrf.mxu0  ;;  %384 = vmin.xlane.f32.xlu0 %v1754_v43 }
 0x125   :  { %v322_v46 = vsub.f32 %v1656_v63, %v306_v58  ;;  %v305_v47 = vmul.f32 2.0, %v282_v61  ;;  %v1761_v48 = vsel %vm347_vm1, %v342_v45, inf  ;;  %v341_v50 = vadd.f32 %v1673_v7, %v319_v42 }
 0x126   :  { %390 = vmin.xlane.f32.xlu1 %v1761_v48 }
 0x127   :  { %v321_v60 = vsub.f32 %v1654_v62, %v305_v47  ;;  %v1768_v51 = vsel %vm347_vm1, %v341_v50, inf  ;;  %v344_v52 = vadd.f32 %v1673_v7, %v322_v46 }
 0x128   :  { %388 = vmin.xlane.f32.xlu0 %v1768_v51 }
 0x129   :  { %v1774_v63 = vsel %vm347_vm1, %v344_v52, inf  ;;  %v343_v53 = vadd.f32 %v1673_v7, %v321_v60 }
 0x12a   :  { %394 = vmin.xlane.f32.xlu1 %v1774_v63 }
 0x12b   :  { %v1780_v1 = vsel %vm347_vm1, %v343_v53, inf }
 0x12c   :  { %392 = vmin.xlane.f32.xlu0 %v1780_v1 }
 0x197   :  { %v367_v62 = vpop.xlane.xlu1 %366 }
 0x198   :  { %vm397_vm2 = vcmp.eq.f32.partialorder %v1679_v22, %v367_v62  ;;  %927 = vst.msk [vmem:[%s2321_s6 + $0x8] sm:$0xff] %vm909_vm0, %v367_v62 }
 0x199   :  { %v1789_v55 = vsel %vm397_vm2, %v1668_v2, 128  ;;  %v365_v7 = vpop.xlane.xlu0 %364 }
 0x19a   :  { %vm396_vm3 = vcmp.eq.f32.partialorder %v1685_v30, %v365_v7  ;;  %926 = vst.msk [vmem:[%s2321_s6] sm:$0xff] %vm909_vm0, %v365_v7  ;;  %v443_v3 = vshra.s32 %v1789_v55, 16 }
 0x19b   :  { %v1798_v22 = vsel %vm396_vm3, %v1668_v2, 128  ;;  %v371_v5 = vpop.xlane.xlu1 %370 }
 0x19c   :  { %vm399_vm4 = vcmp.eq.f32.partialorder %v1691_v37, %v371_v5  ;;  %929 = vst.msk [vmem:[%s2321_s6 + $0x18] sm:$0xff] %vm909_vm0, %v371_v5  ;;  %v1805_v10 = vcvt.s32.f32 %v443_v3  ;;  %v429_v30 = vshra.s32 %v1798_v22, 16 }
 0x19d   :  { %v1809_v12 = vsel %vm399_vm4, %v1668_v2, 128  ;;  %v369_v54 = vpop.xlane.xlu0 %368 }
 0x19e   :  { %vm398_vm5 = vcmp.eq.f32.partialorder %v1698_v44, %v369_v54  ;;  %928 = vst.msk [vmem:[%s2321_s6 + $0x10] sm:$0xff] %vm909_vm0, %v369_v54  ;;  %446 = vmin.xlane.f32.xlu1 %v1805_v10  ;;  %v1817_v37 = vcvt.s32.f32 %v429_v30  ;;  %v471_v13 = vshra.s32 %v1809_v12, 16 }
 0x19f   :  { %v1821_v16 = vsel %vm398_vm5, %v1668_v2, 128  ;;  %v375_v57 = vpop.xlane.xlu1 %374 }
 0x1a0   :  { %vm401_vm6 = vcmp.eq.f32.partialorder %v1705_v49, %v375_v57  ;;  %931 = vst.msk [vmem:[%s2321_s6 + $0x28] sm:$0xff] %vm909_vm0, %v375_v57  ;;  %432 = vmin.xlane.f32.xlu0 %v1817_v37  ;;  %v1829_v44 = vcvt.s32.f32 %v471_v13  ;;  %v457_v18 = vshra.s32 %v1821_v16, 16 }
 0x1a1   :  { %v1833_v19 = vsel %vm401_vm6, %v1668_v2, 128  ;;  %v373_v24 = vpop.xlane.xlu0 %372 }
 0x1a2   :  { %vm400_vm7 = vcmp.eq.f32.partialorder %v1712_v0, %v373_v24  ;;  %930 = vst.msk [vmem:[%s2321_s6 + $0x20] sm:$0xff] %vm909_vm0, %v373_v24  ;;  %474 = vmin.xlane.f32.xlu1 %v1829_v44  ;;  %v1841_v49 = vcvt.s32.f32 %v457_v18  ;;  %v499_v25 = vshra.s32 %v1833_v19, 16 }
 0x1a3   :  { %v1845_v56 = vsel %vm400_vm7, %v1668_v2, 128  ;;  %v379_v26 = vpop.xlane.xlu1 %378 }
 0x1a4   :  { %vm403_vm8 = vcmp.eq.f32.partialorder %v1719_v9, %v379_v26  ;;  %933 = vst.msk [vmem:[%s2321_s6 + $0x38] sm:$0xff] %vm909_vm0, %v379_v26  ;;  %460 = vmin.xlane.f32.xlu0 %v1841_v49  ;;  %v1853_v0 = vcvt.s32.f32 %v499_v25  ;;  %v485_v31 = vshra.s32 %v1845_v56, 16 }
 0x1a5   :  { %v1857_v59 = vsel %vm403_vm8, %v1668_v2, 128  ;;  %v377_v32 = vpop.xlane.xlu0 %376 }
 0x1a6   :  { %vm402_vm9 = vcmp.eq.f32.partialorder %v1726_v14, %v377_v32  ;;  %932 = vst.msk [vmem:[%s2321_s6 + $0x30] sm:$0xff] %vm909_vm0, %v377_v32  ;;  %502 = vmin.xlane.f32.xlu1 %v1853_v0  ;;  %v1865_v9 = vcvt.s32.f32 %v485_v31  ;;  %v527_v34 = vshra.s32 %v1857_v59, 16 }
 0x1a7   :  { %v1869_v38 = vsel %vm402_vm9, %v1668_v2, 128  ;;  %v383_v40 = vpop.xlane.xlu1 %382 }
 0x1a8   :  { %vm405_vm10 = vcmp.eq.f32.partialorder %v1733_v20, %v383_v40  ;;  %935 = vst.msk [vmem:[%s2321_s6 + $0x48] sm:$0xff] %vm909_vm0, %v383_v40  ;;  %488 = vmin.xlane.f32.xlu0 %v1865_v9  ;;  %v1877_v14 = vcvt.s32.f32 %v527_v34  ;;  %v513_v58 = vshra.s32 %v1869_v38, 16  ;;  %v715_v40 = vld [vmem:[#allocation5 + $0x78] sm:$0xff] }
 0x1a9   :  { %v1881_v42 = vsel %vm405_vm10, %v1668_v2, 128  ;;  %v381_v45 = vpop.xlane.xlu0 %380  ;;  %1261 = vmatprep.subr.mxu1 %v715_v40 }
 0x1aa   :  { %vm404_vm11 = vcmp.eq.f32.partialorder %v1740_v28, %v381_v45  ;;  %934 = vst.msk [vmem:[%s2321_s6 + $0x40] sm:$0xff] %vm909_vm0, %v381_v45  ;;  %530 = vmin.xlane.f32.xlu1 %v1877_v14  ;;  %v1889_v20 = vcvt.s32.f32 %v513_v58  ;;  %v555_v61 = vshra.s32 %v1881_v42, 16  ;;  %v714_v58 = vld [vmem:[#allocation5 + $0x70] sm:$0xff]  ;;  %1262 = vmatpush3.msra.mxu1 %v715_v40  ;;  %v713_v45 = vld [vmem:[#allocation5 + $0x68] sm:$0xff] }
 0x1ab   :  { %v1893_v46 = vsel %vm404_vm11, %v1668_v2, 128  ;;  %v387_v47 = vpop.xlane.xlu1 %386  ;;  %1263 = vmatprep.subr.mxu1 %v714_v58 }
 0x1ac   :  { %vm407_vm12 = vcmp.eq.f32.partialorder %v1747_v36, %v387_v47  ;;  %937 = vst.msk [vmem:[%s2321_s6 + $0x58] sm:$0xff] %vm909_vm0, %v387_v47  ;;  %516 = vmin.xlane.f32.xlu0 %v1889_v20  ;;  %v1901_v28 = vcvt.s32.f32 %v555_v61  ;;  %v541_v50 = vshra.s32 %v1893_v46, 16  ;;  %1264 = vmatpush3.msra.mxu1 %v714_v58  ;;  %v712_v61 = vld [vmem:[#allocation5 + $0x60] sm:$0xff]  ;;  %v711_v47 = vld [vmem:[#allocation5 + $0x58] sm:$0xff] }
 0x1ad   :  { %v1905_v60 = vsel %vm407_vm12, %v1668_v2, 128  ;;  %v385_v52 = vpop.xlane.xlu0 %384  ;;  %1265 = vmatprep.subr.mxu1 %v713_v45 }
 0x1ae   :  { %vm406_vm13 = vcmp.eq.f32.partialorder %v1754_v43, %v385_v52  ;;  %936 = vst.msk [vmem:[%s2321_s6 + $0x50] sm:$0xff] %vm909_vm0, %v385_v52  ;;  %558 = vmin.xlane.f32.xlu1 %v1901_v28  ;;  %v1913_v36 = vcvt.s32.f32 %v541_v50  ;;  %v583_v53 = vshra.s32 %v1905_v60, 16  ;;  %1266 = vmatpush3.msra.mxu1 %v713_v45  ;;  %v710_v50 = vld [vmem:[#allocation5 + $0x50] sm:$0xff]  ;;  %v709_v52 = vld [vmem:[#allocation5 + $0x48] sm:$0xff] }
 0x1af   :  { %v1917_v62 = vsel %vm406_vm13, %v1668_v2, 128  ;;  %v391_v7 = vpop.xlane.xlu1 %390  ;;  %1267 = vmatprep.subr.mxu1 %v712_v61 }
 0x1b0   :  { %vm409_vm14 = vcmp.eq.f32.partialorder %v1761_v48, %v391_v7  ;;  %939 = vst.msk [vmem:[%s2321_s6 + $0x68] sm:$0xff] %vm909_vm0, %v391_v7  ;;  %544 = vmin.xlane.f32.xlu0 %v1913_v36  ;;  %v1925_v43 = vcvt.s32.f32 %v583_v53  ;;  %v569_v3 = vshra.s32 %v1917_v62, 16  ;;  %1268 = vmatpush3.msra.mxu1 %v712_v61  ;;  %v708_v53 = vld [vmem:[#allocation5 + $0x40] sm:$0xff]  ;;  %v707_v7 = vld [vmem:[#allocation5 + $0x38] sm:$0xff]  ;;  %v456_v61 = vand.u32 65535, %v1821_v16 }
 0x1b1   :  { %v1929_v5 = vsel %vm409_vm14, %v1668_v2, 128  ;;  %v389_v30 = vpop.xlane.xlu0 %388  ;;  %1269 = vmatprep.subr.mxu1 %v711_v47  ;;  %v484_v16 = vand.u32 65535, %v1845_v56  ;;  %v512_v56 = vand.u32 65535, %v1869_v38  ;;  %v540_v38 = vand.u32 65535, %v1893_v46  ;;  %v701_v46 = vld [vmem:[#allocation5 + $0x8] sm:$0xff] }
 0x1b2   :  { %vm408_vm15 = vcmp.eq.f32.partialorder %v1768_v51, %v389_v30  ;;  %938 = vst.msk [vmem:[%s2321_s6 + $0x60] sm:$0xff] %vm909_vm0, %v389_v30  ;;  %586 = vmin.xlane.f32.xlu1 %v1925_v43  ;;  %v1937_v48 = vcvt.s32.f32 %v569_v3  ;;  %v611_v54 = vshra.s32 %v1929_v5, 16  ;;  %1270 = vmatpush3.msra.mxu1 %v711_v47  ;;  %v706_v3 = vld [vmem:[#allocation5 + $0x30] sm:$0xff]  ;;  %v705_v30 = vld [vmem:[#allocation5 + $0x28] sm:$0xff] }
 0x1b3   :  { %v1941_v13 = vsel %vm408_vm15, %v1668_v2, 128  ;;  %v395_v57 = vpop.xlane.xlu1 %394  ;;  %1271 = vmatprep.subr.mxu1 %v710_v50 }
 0x1b4   :  { %vm411_vm1 = vcmp.eq.f32.partialorder %v1774_v63, %v395_v57  ;;  %941 = vst.msk [vmem:[%s2321_s6 + $0x78] sm:$0xff] %vm909_vm0, %v395_v57  ;;  %572 = vmin.xlane.f32.xlu0 %v1937_v48  ;;  %v1949_v51 = vcvt.s32.f32 %v611_v54  ;;  %v597_v18 = vshra.s32 %v1941_v13, 16  ;;  %1272 = vmatpush3.msra.mxu1 %v710_v50  ;;  %v704_v54 = vld [vmem:[#allocation5 + $0x20] sm:$0xff]  ;;  %v442_v57 = vand.u32 65535, %v1789_v55 }
 0x1b5   :  { %v1953_v24 = vsel %vm411_vm1, %v1668_v2, 128  ;;  %v393_v25 = vpop.xlane.xlu0 %392  ;;  %1273 = vmatprep.subr.mxu1 %v709_v52  ;;  %v498_v50 = vand.u32 65535, %v1833_v19  ;;  %v526_v19 = vand.u32 65535, %v1857_v59  ;;  %v554_v59 = vand.u32 65535, %v1881_v42 }
 0x1b6   :  { %vm410_vm2 = vcmp.eq.f32.partialorder %v1780_v1, %v393_v25  ;;  %940 = vst.msk [vmem:[%s2321_s6 + $0x70] sm:$0xff] %vm909_vm0, %v393_v25  ;;  %614 = vmin.xlane.f32.xlu1 %v1949_v51  ;;  %v1961_v63 = vcvt.s32.f32 %v597_v18  ;;  %v639_v26 = vshra.s32 %v1953_v24, 16  ;;  %1274 = vmatpush3.msra.mxu1 %v709_v52  ;;  %v428_v18 = vand.u32 65535, %v1798_v22 }
 0x1b7   :  { %v1965_v31 = vsel %vm410_vm2, %v1668_v2, 128  ;;  %1275 = vmatprep.subr.mxu1 %v708_v53  ;;  %v458_v52 = vcvt.s32.f32 %v456_v61 }
 0x1b8   :  { %600 = vmin.xlane.f32.xlu0 %v1961_v63  ;;  %v1968_v32 = vcvt.s32.f32 %v639_v26  ;;  %v625_v1 = vshra.s32 %v1965_v31, 16  ;;  %1276 = vmatpush3.msra.mxu1 %v708_v53  ;;  %v444_v26 = vcvt.s32.f32 %v442_v57  ;;  %v430_v45 = vcvt.s32.f32 %v428_v18 }
 0x1b9   :  { %1277 = vmatprep.subr.mxu1 %v707_v7  ;;  %v528_v57 = vcvt.s32.f32 %v526_v19 }
 0x1ba   :  { %642 = vmin.xlane.f32.xlu1 %v1968_v32  ;;  %v1972_v34 = vcvt.s32.f32 %v625_v1  ;;  %1278 = vmatpush3.msra.mxu1 %v707_v7  ;;  %v470_v1 = vand.u32 65535, %v1809_v12  ;;  %v500_v7 = vcvt.s32.f32 %v498_v50 }
 0x1bb   :  { %1279 = vmatprep.subr.mxu1 %v706_v3 }
 0x1bc   :  { %628 = vmin.xlane.f32.xlu0 %v1972_v34  ;;  %1280 = vmatpush3.msra.mxu1 %v706_v3  ;;  %v472_v47 = vcvt.s32.f32 %v470_v1  ;;  %v514_v1 = vcvt.s32.f32 %v512_v56 }
 0x1bd   :  { %1281 = vmatprep.subr.mxu1 %v705_v30 }
 0x1be   :  { %1282 = vmatpush3.msra.mxu1 %v705_v30  ;;  %v486_v30 = vcvt.s32.f32 %v484_v16 }
 0x1bf   :  { %1283 = vmatprep.subr.mxu1 %v704_v54 }
 0x1c0   :  { %1284 = vmatpush3.msra.mxu1 %v704_v54 }
 0x227   :  { %v1977_v25 = vpop.xlane.xlu1 %446 }
 0x228   :  { %vm448_vm3 = vcmp.eq.f32.partialorder %v1805_v10, %v1977_v25 }
 0x229   :  { %v1982_v40 = vpop.xlane.xlu0 %432  ;;  %v449_v58 = vsel %vm448_vm3, %v444_v26, inf }
 0x22a   :  { %450 = vmin.xlane.f32.xlu1 %v449_v58  ;;  %vm434_vm4 = vcmp.eq.f32.partialorder %v1817_v37, %v1982_v40 }
 0x22b   :  { %v1987_v55 = vpop.xlane.xlu1 %474  ;;  %v435_v22 = vsel %vm434_vm4, %v430_v45, inf  ;;  %v556_v45 = vcvt.s32.f32 %v554_v59 }
 0x22c   :  { %436 = vmin.xlane.f32.xlu0 %v435_v22  ;;  %vm476_vm5 = vcmp.eq.f32.partialorder %v1829_v44, %v1987_v55 }
 0x22d   :  { %v1992_v10 = vpop.xlane.xlu0 %460  ;;  %v477_v12 = vsel %vm476_vm5, %v472_v47, inf  ;;  %v542_v47 = vcvt.s32.f32 %v540_v38 }
 0x22e   :  { %478 = vmin.xlane.f32.xlu1 %v477_v12  ;;  %vm462_vm6 = vcmp.eq.f32.partialorder %v1841_v49, %v1992_v10 }
 0x22f   :  { %v1997_v37 = vpop.xlane.xlu1 %502  ;;  %v463_v53 = vsel %vm462_vm6, %v458_v52, inf }
 0x230   :  { %464 = vmin.xlane.f32.xlu0 %v463_v53  ;;  %vm504_vm7 = vcmp.eq.f32.partialorder %v1853_v0, %v1997_v37  ;;  %v703_v0 = vld [vmem:[#allocation5 + $0x18] sm:$0xff] }
 0x231   :  { %v2002_v44 = vpop.xlane.xlu0 %488  ;;  %v505_v3 = vsel %vm504_vm7, %v500_v7, inf  ;;  %1285 = vmatprep.subr.mxu1 %v703_v0 }
 0x232   :  { %506 = vmin.xlane.f32.xlu1 %v505_v3  ;;  %vm490_vm8 = vcmp.eq.f32.partialorder %v1865_v9, %v2002_v44  ;;  %1286 = vmatpush3.msra.mxu1 %v703_v0  ;;  %v702_v9 = vld [vmem:[#allocation5 + $0x10] sm:$0xff]  ;;  %v638_v3 = vand.u32 65535, %v1953_v24 }
 0x233   :  { %v2007_v49 = vpop.xlane.xlu1 %530  ;;  %v491_v54 = vsel %vm490_vm8, %v486_v30, inf  ;;  %1287 = vmatprep.subr.mxu1 %v702_v9 }
 0x234   :  { %492 = vmin.xlane.f32.xlu0 %v491_v54  ;;  %vm532_vm9 = vcmp.eq.f32.partialorder %v1877_v14, %v2007_v49  ;;  %v582_v14 = vand.u32 65535, %v1905_v60  ;;  %1288 = vmatpush3.msra.mxu1 %v702_v9  ;;  %v700_v60 = vld [vmem:[#allocation5] sm:$0xff] }
 0x235   :  { %v2012_v18 = vpop.xlane.xlu0 %516  ;;  %v533_v26 = vsel %vm532_vm9, %v528_v57, inf  ;;  %1289 = vmatprep.subr.mxu1 %v701_v46  ;;  %v640_v57 = vcvt.s32.f32 %v638_v3 }
 0x236   :  { %534 = vmin.xlane.f32.xlu1 %v533_v26  ;;  %vm518_vm10 = vcmp.eq.f32.partialorder %v1889_v20, %v2012_v18  ;;  %v568_v20 = vand.u32 65535, %v1917_v62  ;;  %1290 = vmatpush3.msra.mxu1 %v701_v46  ;;  %v584_v52 = vcvt.s32.f32 %v582_v14 }
 0x237   :  { %v2017_v58 = vpop.xlane.xlu1 %558  ;;  %v519_v42 = vsel %vm518_vm10, %v514_v1, inf  ;;  %1291 = vmatprep.subr.mxu1 %v700_v60 }
 0x238   :  { %520 = vmin.xlane.f32.xlu0 %v519_v42  ;;  %vm560_vm11 = vcmp.eq.f32.partialorder %v1901_v28, %v2017_v58  ;;  %v610_v28 = vand.u32 65535, %v1929_v5  ;;  %1292 = vmatpush3.msra.mxu1 %v700_v60  ;;  %v570_v53 = vcvt.s32.f32 %v568_v20 }
 0x239   :  { %v2022_v61 = vpop.xlane.xlu0 %544  ;;  %v561_v22 = vsel %vm560_vm11, %v556_v45, inf  ;;  %v523_v45 = vcvt.f32.s32 %v2012_v18 }
 0x23a   :  { %562 = vmin.xlane.f32.xlu1 %v561_v22  ;;  %vm546_vm12 = vcmp.eq.f32.partialorder %v1913_v36, %v2022_v61  ;;  %v596_v36 = vand.u32 65535, %v1941_v13  ;;  %v612_v5 = vcvt.s32.f32 %v610_v28  ;;  %v624_v13 = vand.u32 65535, %v1965_v31 }
 0x23b   :  { %v2027_v50 = vpop.xlane.xlu1 %586  ;;  %v547_v12 = vsel %vm546_vm12, %v542_v47, inf  ;;  %v565_v47 = vcvt.f32.s32 %v2017_v58  ;;  %v551_v60 = vcvt.f32.s32 %v2022_v61 }
 0x23c   :  { %548 = vmin.xlane.f32.xlu0 %v547_v12  ;;  %vm588_vm13 = vcmp.eq.f32.partialorder %v1925_v43, %v2027_v50  ;;  %v598_v56 = vcvt.s32.f32 %v596_v36  ;;  %v626_v59 = vcvt.s32.f32 %v624_v13  ;;  %v593_v36 = vcvt.f32.s32 %v2027_v50 }
 0x23d   :  { %v2032_v62 = vpop.xlane.xlu0 %572  ;;  %v589_v16 = vsel %vm588_vm13, %v584_v52, inf  ;;  %v524_v52 = vshll.u32 %v523_v45, 16 }
 0x23e   :  { %590 = vmin.xlane.f32.xlu1 %v589_v16  ;;  %vm574_vm14 = vcmp.eq.f32.partialorder %v1937_v48, %v2032_v62 }
 0x23f   :  { %v2037_v7 = vpop.xlane.xlu1 %614  ;;  %v575_v19 = vsel %vm574_vm14, %v570_v53, inf  ;;  %v566_v53 = vshll.u32 %v565_v47, 16 }
 0x240   :  { %576 = vmin.xlane.f32.xlu0 %v575_v19  ;;  %vm616_vm15 = vcmp.eq.f32.partialorder %v1949_v51, %v2037_v7 }
 0x241   :  { %v2042_v43 = vpop.xlane.xlu0 %600  ;;  %v617_v30 = vsel %vm616_vm15, %v612_v5, inf  ;;  %v552_v5 = vshll.u32 %v551_v60, 16 }
 0x242   :  { %618 = vmin.xlane.f32.xlu1 %v617_v30  ;;  %vm602_vm1 = vcmp.eq.f32.partialorder %v1961_v63, %v2042_v43  ;;  %v579_v30 = vcvt.f32.s32 %v2032_v62 }
 0x243   :  { %v2047_v48 = vpop.xlane.xlu1 %642  ;;  %v603_v54 = vsel %vm602_vm1, %v598_v56, inf }
 0x244   :  { %604 = vmin.xlane.f32.xlu0 %v603_v54  ;;  %vm644_vm2 = vcmp.eq.f32.partialorder %v1968_v32, %v2047_v48  ;;  %v594_v54 = vshll.u32 %v593_v36, 16 }
 0x245   :  { %v2051_v24 = vpop.xlane.xlu0 %628  ;;  %v645_v51 = vsel %vm644_vm2, %v640_v57, inf  ;;  %v621_v57 = vcvt.f32.s32 %v2037_v7 }
 0x246   :  { %646 = vmin.xlane.f32.xlu1 %v645_v51  ;;  %vm630_vm3 = vcmp.eq.f32.partialorder %v1972_v34, %v2051_v24  ;;  %v495_v34 = vcvt.f32.s32 %v2002_v44  ;;  %v537_v44 = vcvt.f32.s32 %v2007_v49 }
 0x247   :  { %v631_v31 = vsel %vm630_vm3, %v626_v59, inf  ;;  %v607_v59 = vcvt.f32.s32 %v2042_v43 }
 0x248   :  { %632 = vmin.xlane.f32.xlu0 %v631_v31  ;;  %v496_v9 = vshll.u32 %v495_v34, 16  ;;  %v538_v22 = vshll.u32 %v537_v44, 16 }
 0x24a   :  { %1008 = vadd.xlane.f32.xlu1 %v1508_v8  ;;  %v481_v8 = vcvt.f32.s32 %v1987_v55 }
 0x24c   :  { %1006 = vadd.xlane.f32.xlu0 %v1501_v4  ;;  %v453_v4 = vcvt.f32.s32 %v1977_v25 }
 0x24e   :  { %1012 = vadd.xlane.f32.xlu1 %v1512_v11 }
 0x250   :  { %1010 = vadd.xlane.f32.xlu0 %v1504_v6  ;;  %v439_v6 = vcvt.f32.s32 %v1982_v40 }
 0x252   :  { %1016 = vadd.xlane.f32.xlu1 %v1520_v17 }
 0x254   :  { %1014 = vadd.xlane.f32.xlu0 %v1518_v15  ;;  %v454_v15 = vshll.u32 %v453_v4, 16  ;;  %v580_v4 = vshll.u32 %v579_v30, 16 }
 0x256   :  { %1020 = vadd.xlane.f32.xlu1 %v1528_v23  ;;  %v440_v23 = vshll.u32 %v439_v6, 16 }
 0x258   :  { %1018 = vadd.xlane.f32.xlu0 %v1526_v21 }
 0x25a   :  { %1024 = vadd.xlane.f32.xlu1 %v1536_v29 }
 0x25c   :  { %1022 = vadd.xlane.f32.xlu0 %v1534_v27  ;;  %v467_v27 = vcvt.f32.s32 %v1992_v10 }
 0x25e   :  { %1028 = vadd.xlane.f32.xlu1 %v1544_v35  ;;  %v468_v40 = vshll.u32 %v467_v27, 16  ;;  %v635_v27 = vcvt.f32.s32 %v2051_v24 }
 0x260   :  { %1026 = vadd.xlane.f32.xlu0 %v1542_v33  ;;  %v482_v33 = vshll.u32 %v481_v8, 16 }
 0x262   :  { %1032 = vadd.xlane.f32.xlu1 %v1552_v41  ;;  %v509_v41 = vcvt.f32.s32 %v1997_v37  ;;  %v1431_v37 = vmov 1.0  }
 0x264   :  { %1030 = vadd.xlane.f32.xlu0 %v1550_v39  ;;  %v510_v26 = vshll.u32 %v509_v41, 16 }
 0x2b3   :  { %v451_v11 = vpop.xlane.xlu1 %450 }
 0x2b4   :  { %v452_v17 = vcvt.f32.s32 %v451_v11  ;;  %v622_v11 = vshll.u32 %v621_v57, 16 }
 0x2b5   :  { %v437_v21 = vpop.xlane.xlu0 %436 }
 0x2b6   :  { %v455_v29 = vadd.s32 %v454_v15, %v452_v17  ;;  %v438_v35 = vcvt.f32.s32 %v437_v21  ;;  %v649_v15 = vcvt.f32.s32 %v2047_v48  ;;  %v608_v21 = vshll.u32 %v607_v59, 16 }
 0x2b7   :  { %v479_v63 = vpop.xlane.xlu1 %478 }
 0x2b8   :  { %911 = vst.msk [vmem:[%s2320_s5 + $0x8] sm:$0xff] %vm909_vm0, %v455_v29  ;;  %v480_v39 = vcvt.f32.s32 %v479_v63  ;;  %v441_v32 = vadd.s32 %v440_v23, %v438_v35  ;;  %vm653_vm5 = vcmp.eq.s32.totalorder %v1668_v2, %v455_v29 }
 0x2b9   :  { %v465_v25 = vpop.xlane.xlu0 %464 }
 0x2ba   :  { %v483_v55 = vadd.s32 %v482_v33, %v480_v39  ;;  %v466_v0 = vcvt.f32.s32 %v465_v25  ;;  %vm652_vm4 = vcmp.eq.s32.totalorder %v1668_v2, %v441_v32  ;;  %910 = vst.msk [vmem:[%s2320_s5] sm:$0xff] %vm909_vm0, %v441_v32  ;;  %v650_v33 = vshll.u32 %v649_v15, 16 }
 0x2bb   :  { %v507_v10 = vpop.xlane.xlu1 %506  ;;  %1293 = vmatprep.mubr.msk.f32.mxu1 %vm652_vm4, %v1431_v37  ;;  %v636_v39 = vshll.u32 %v635_v27, 16 }
 0x2bc   :  { %913 = vst.msk [vmem:[%s2320_s5 + $0x18] sm:$0xff] %vm909_vm0, %v483_v55  ;;  %v469_v1 = vadd.s32 %v468_v40, %v466_v0  ;;  %v508_v38 = vcvt.f32.s32 %v507_v10  ;;  %1294 = vmatmul.mubr.msk.f32.vlgmr.msra.gmra.mxu1 %vm653_vm5, %v1431_v37  ;;  %vm655_vm7 = vcmp.eq.s32.totalorder %v1668_v2, %v483_v55 }
 0x2bd   :  { %v493_v42 = vpop.xlane.xlu0 %492 }
 0x2be   :  { %912 = vst.msk [vmem:[%s2320_s5 + $0x10] sm:$0xff] %vm909_vm0, %v469_v1  ;;  %v511_v14 = vadd.s32 %v510_v26, %v508_v38  ;;  %v494_v49 = vcvt.f32.s32 %v493_v42  ;;  %vm654_vm6 = vcmp.eq.s32.totalorder %v1668_v2, %v469_v1 }
 0x2bf   :  { %v535_v46 = vpop.xlane.xlu1 %534  ;;  %1296 = vmatprep.mubr.msk.f32.mxu1 %vm654_vm6, %v1431_v37 }
 0x2c0   :  { %915 = vst.msk [vmem:[%s2320_s5 + $0x28] sm:$0xff] %vm909_vm0, %v511_v14  ;;  %v497_v18 = vadd.s32 %v496_v9, %v494_v49  ;;  %v536_v20 = vcvt.f32.s32 %v535_v46  ;;  %1297 = vmatmul.mubr.msk.f32.gmra.mxu1 %vm655_vm7, %v1431_v37  ;;  %vm657_vm9 = vcmp.eq.s32.totalorder %v1668_v2, %v511_v14  ;;  %v1324_v46 = vld [vmem:[#allocation2 + $0x8] sm:$0xff] }
 0x2c1   :  { %v521_v12 = vpop.xlane.xlu0 %520 }
 0x2c2   :  { %914 = vst.msk [vmem:[%s2320_s5 + $0x20] sm:$0xff] %vm909_vm0, %v497_v18  ;;  %v539_v28 = vadd.s32 %v538_v22, %v536_v20  ;;  %v522_v58 = vcvt.f32.s32 %v521_v12  ;;  %vm656_vm8 = vcmp.eq.s32.totalorder %v1668_v2, %v497_v18  ;;  %v1325_v20 = vld [vmem:[#allocation2] sm:$0xff] }
 0x2c3   :  { %v563_v16 = vpop.xlane.xlu1 %562  ;;  %1299 = vmatprep.mubr.msk.f32.mxu1 %vm656_vm8, %v1431_v37 }
 0x2c4   :  { %917 = vst.msk [vmem:[%s2320_s5 + $0x38] sm:$0xff] %vm909_vm0, %v539_v28  ;;  %v525_v61 = vadd.s32 %v524_v52, %v522_v58  ;;  %v564_v19 = vcvt.f32.s32 %v563_v16  ;;  %1300 = vmatmul.mubr.msk.f32.gmra.mxu1 %vm657_vm9, %v1431_v37  ;;  %vm659_vm11 = vcmp.eq.s32.totalorder %v1668_v2, %v539_v28  ;;  %v1326_v58 = vld [vmem:[#allocation2 + $0x18] sm:$0xff] }
 0x2c5   :  { %v549_v3 = vpop.xlane.xlu0 %548 }
 0x2c6   :  { %916 = vst.msk [vmem:[%s2320_s5 + $0x30] sm:$0xff] %vm909_vm0, %v525_v61  ;;  %v567_v56 = vadd.s32 %v566_v53, %v564_v19  ;;  %v550_v50 = vcvt.f32.s32 %v549_v3  ;;  %vm658_vm10 = vcmp.eq.s32.totalorder %v1668_v2, %v525_v61  ;;  %v1327_v19 = vld [vmem:[#allocation2 + $0x10] sm:$0xff] }
 0x2c7   :  { %v591_v13 = vpop.xlane.xlu1 %590  ;;  %1302 = vmatprep.mubr.msk.f32.mxu1 %vm658_vm10, %v1431_v37 }
 0x2c8   :  { %919 = vst.msk [vmem:[%s2320_s5 + $0x48] sm:$0xff] %vm909_vm0, %v567_v56  ;;  %v553_v62 = vadd.s32 %v552_v5, %v550_v50  ;;  %v592_v51 = vcvt.f32.s32 %v591_v13  ;;  %1303 = vmatmul.mubr.msk.f32.gmra.mxu1 %vm659_vm11, %v1431_v37  ;;  %vm661_vm13 = vcmp.eq.s32.totalorder %v1668_v2, %v567_v56  ;;  %v1328_v50 = vld [vmem:[#allocation2 + $0x28] sm:$0xff] }
 0x2c9   :  { %v577_v31 = vpop.xlane.xlu0 %576 }
 0x2ca   :  { %918 = vst.msk [vmem:[%s2320_s5 + $0x40] sm:$0xff] %vm909_vm0, %v553_v62  ;;  %v595_v6 = vadd.s32 %v594_v54, %v592_v51  ;;  %v578_v7 = vcvt.f32.s32 %v577_v31  ;;  %vm660_vm12 = vcmp.eq.s32.totalorder %v1668_v2, %v553_v62  ;;  %v1329_v51 = vld [vmem:[#allocation2 + $0x20] sm:$0xff] }
 0x2cb   :  { %v619_v8 = vpop.xlane.xlu1 %618  ;;  %1305 = vmatprep.mubr.msk.f32.mxu1 %vm660_vm12, %v1431_v37 }
 0x2cc   :  { %921 = vst.msk [vmem:[%s2320_s5 + $0x58] sm:$0xff] %vm909_vm0, %v595_v6  ;;  %v581_v43 = vadd.s32 %v580_v4, %v578_v7  ;;  %v620_v17 = vcvt.f32.s32 %v619_v8  ;;  %1306 = vmatmul.mubr.msk.f32.gmra.mxu1 %vm661_vm13, %v1431_v37  ;;  %vm663_vm15 = vcmp.eq.s32.totalorder %v1668_v2, %v595_v6  ;;  %v1330_v7 = vld [vmem:[#allocation2 + $0x38] sm:$0xff] }
 0x2cd   :  { %v605_v23 = vpop.xlane.xlu0 %604 }
 0x2ce   :  { %920 = vst.msk [vmem:[%s2320_s5 + $0x50] sm:$0xff] %vm909_vm0, %v581_v43  ;;  %v623_v29 = vadd.s32 %v622_v11, %v620_v17  ;;  %v606_v48 = vcvt.f32.s32 %v605_v23  ;;  %vm662_vm14 = vcmp.eq.s32.totalorder %v1668_v2, %v581_v43  ;;  %v1331_v17 = vld [vmem:[#allocation2 + $0x30] sm:$0xff] }
 0x2cf   :  { %v647_v35 = vpop.xlane.xlu1 %646  ;;  %1308 = vmatprep.mubr.msk.f32.mxu1 %vm662_vm14, %v1431_v37 }
 0x2d0   :  { %923 = vst.msk [vmem:[%s2320_s5 + $0x68] sm:$0xff] %vm909_vm0, %v623_v29  ;;  %v609_v24 = vadd.s32 %v608_v21, %v606_v48  ;;  %v648_v63 = vcvt.f32.s32 %v647_v35  ;;  %1309 = vmatmul.mubr.msk.f32.gmra.mxu1 %vm663_vm15, %v1431_v37  ;;  %vm665_vm2 = vcmp.eq.s32.totalorder %v1668_v2, %v623_v29  ;;  %v1332_v48 = vld [vmem:[#allocation2 + $0x48] sm:$0xff] }
 0x2d1   :  { %v633_v41 = vpop.xlane.xlu0 %632 }
 0x2d2   :  { %922 = vst.msk [vmem:[%s2320_s5 + $0x60] sm:$0xff] %vm909_vm0, %v609_v24  ;;  %v651_v32 = vadd.s32 %v650_v33, %v648_v63  ;;  %v634_v34 = vcvt.f32.s32 %v633_v41  ;;  %vm664_vm1 = vcmp.eq.s32.totalorder %v1668_v2, %v609_v24  ;;  %v1333_v41 = vld [vmem:[#allocation2 + $0x40] sm:$0xff] }
 0x2d3   :  { %1311 = vmatprep.mubr.msk.f32.mxu1 %vm664_vm1, %v1431_v37  ;;  %v1009_v40 = vpop.xlane.xlu1 %1008 }
 0x2d4   :  { %925 = vst.msk [vmem:[%s2320_s5 + $0x78] sm:$0xff] %vm909_vm0, %v651_v32  ;;  %v637_v25 = vadd.s32 %v636_v39, %v634_v34  ;;  %1312 = vmatmul.mubr.msk.f32.gmra.mxu1 %vm665_vm2, %v1431_v37  ;;  %vm667_vm4 = vcmp.eq.s32.totalorder %v1668_v2, %v651_v32  ;;  %1039 = vst.msk [vmem:[%s2323_s8 + $0x8] sm:$0xff] %vm909_vm0, %v1009_v40  ;;  %v1334_v40 = vld [vmem:[#allocation2 + $0x58] sm:$0xff] }
 0x2d5   :  { %v1007_v55 = vpop.xlane.xlu0 %1006 }
 0x2d6   :  { %924 = vst.msk [vmem:[%s2320_s5 + $0x70] sm:$0xff] %vm909_vm0, %v637_v25  ;;  %vm666_vm3 = vcmp.eq.s32.totalorder %v1668_v2, %v637_v25  ;;  %1038 = vst.msk [vmem:[%s2323_s8] sm:$0xff] %vm909_vm0, %v1007_v55  ;;  %s1400_s5 = scalar_lea.vmem %s1076_s28, 2048 }
 0x2d7   :  { %1314 = vmatprep.mubr.msk.f32.mxu1 %vm666_vm3, %v1431_v37  ;;  %v1013_v0 = vpop.xlane.xlu1 %1012  ;;  %p1401_p1 = scmp.ne.s32.totalorder %s1076_s28, %s1400_s5  ;;  %p1406_p3 = scmp.lt.s32.totalorder %s1400_s5, %s1400_s5 }
 0x2d8   :  { %1315 = vmatmul.mubr.msk.f32.gmra.mxu1 %vm667_vm4, %v1431_v37  ;;  %1041 = vst.msk [vmem:[%s2323_s8 + $0x18] sm:$0xff] %vm909_vm0, %v1013_v0 }
 0x2d9   :  { %v1011_v10 = vpop.xlane.xlu0 %1010  ;;  %p1407_p4 = por %p1406_p3, %p1405_p2 }
 0x2da   :  { %1040 = vst.msk [vmem:[%s2323_s8 + $0x10] sm:$0xff] %vm909_vm0, %v1011_v10 }
 0x2db   :  { %v1017_v2 = vpop.xlane.xlu1 %1016  ;;  %p1408_p5 = pnand %p1407_p4, %p1401_p1 }
 0x2dc   :  { %1043 = vst.msk [vmem:[%s2323_s8 + $0x28] sm:$0xff] %vm909_vm0, %v1017_v2 }
 0x2dd   :  { %v1015_v37 = vpop.xlane.xlu0 %1014 }
 0x2de   :  { %1042 = vst.msk [vmem:[%s2323_s8 + $0x20] sm:$0xff] %vm909_vm0, %v1015_v37  ;;  %v1335_v37 = vld [vmem:[#allocation2 + $0x50] sm:$0xff] }
 0x2df   :  { %v1021_v26 = vpop.xlane.xlu1 %1020 }
 0x2e0   :  { %1045 = vst.msk [vmem:[%s2323_s8 + $0x38] sm:$0xff] %vm909_vm0, %v1021_v26 }
 0x2e1   :  { %v1019_v44 = vpop.xlane.xlu0 %1018 }
 0x2e2   :  { %1044 = vst.msk [vmem:[%s2323_s8 + $0x30] sm:$0xff] %vm909_vm0, %v1019_v44 }
 0x2e3   :  { %v1025_v1 = vpop.xlane.xlu1 %1024 }
 0x2e4   :  { %1047 = vst.msk [vmem:[%s2323_s8 + $0x48] sm:$0xff] %vm909_vm0, %v1025_v1 }
 0x2e5   :  { %v1023_v38 = vpop.xlane.xlu0 %1022 }
 0x2e6   :  { %1046 = vst.msk [vmem:[%s2323_s8 + $0x40] sm:$0xff] %vm909_vm0, %v1023_v38 }
 0x2e7   :  { %v1029_v9 = vpop.xlane.xlu1 %1028 }
 0x2e8   :  { %1049 = vst.msk [vmem:[%s2323_s8 + $0x58] sm:$0xff] %vm909_vm0, %v1029_v9  ;;  %v1336_v9 = vld [vmem:[#allocation2 + $0x68] sm:$0xff] }
 0x2e9   :  { %v1027_v42 = vpop.xlane.xlu0 %1026 }
 0x2ea   :  { %1048 = vst.msk [vmem:[%s2323_s8 + $0x50] sm:$0xff] %vm909_vm0, %v1027_v42 }
 0x2eb   :  { %v1033_v45 = vpop.xlane.xlu1 %1032 }
 0x2ec   :  { %1051 = vst.msk [vmem:[%s2323_s8 + $0x68] sm:$0xff] %vm909_vm0, %v1033_v45 }
 0x2ed   :  { %v1031_v14 = vpop.xlane.xlu0 %1030 }
 0x2ee   :  { %1050 = vst.msk [vmem:[%s2323_s8 + $0x60] sm:$0xff] %vm909_vm0, %v1031_v14 }
 0x37c   :  { %v1295_v49 = vpop.f32.mrf.mxu1 }
 0x37d   :  { %v862_v22 = vsub.f32 %v1295_v49, %v1324_v46 }
 0x37e   :  { %v782_v47 = vpop.f32.mrf.mxu1 }
 0x37f   :  { %v878_v18 = vadd.f32 %v1324_v46, %v862_v22  ;;  %v861_v60 = vsub.f32 %v782_v47, %v1325_v20  ;;  %v943_v12 = vmul.f32 %v862_v22, %v862_v22  ;;  %v1337_v46 = vld [vmem:[#allocation2 + $0x60] sm:$0xff] }
 0x380   :  { %v1298_v52 = vpop.f32.mrf.mxu1 }
 0x381   :  { %894 = vst [vmem:[#allocation8 + $0x8] sm:$0xff] %v878_v18  ;;  %v877_v28 = vadd.f32 %v1325_v20, %v861_v60  ;;  %v864_v16 = vsub.f32 %v1298_v52, %v1326_v58  ;;  %960 = vadd.xlane.f32.xlu1 %v943_v12  ;;  %v942_v53 = vmul.f32 %v861_v60, %v861_v60  ;;  %v1338_v60 = vld [vmem:[#allocation2 + $0x78] sm:$0xff] }
 0x382   :  { %v792_v36 = vpop.f32.mrf.mxu1 }
 0x383   :  { %893 = vst [vmem:[#allocation8] sm:$0xff] %v877_v28  ;;  %v880_v61 = vadd.f32 %v1326_v58, %v864_v16  ;;  %v863_v5 = vsub.f32 %v792_v36, %v1327_v19  ;;  %958 = vadd.xlane.f32.xlu0 %v942_v53  ;;  %v945_v3 = vmul.f32 %v864_v16, %v864_v16  ;;  %v1339_v16 = vld [vmem:[#allocation2 + $0x70] sm:$0xff] }
 0x384   :  { %v1301_v30 = vpop.f32.mrf.mxu1 }
 0x385   :  { %896 = vst [vmem:[#allocation8 + $0x18] sm:$0xff] %v880_v61  ;;  %v879_v56 = vadd.f32 %v1327_v19, %v863_v5  ;;  %v866_v13 = vsub.f32 %v1301_v30, %v1328_v50  ;;  %964 = vadd.xlane.f32.xlu1 %v945_v3  ;;  %v944_v54 = vmul.f32 %v863_v5, %v863_v5 }
 0x386   :  { %v802_v57 = vpop.f32.mrf.mxu1 }
 0x387   :  { %895 = vst [vmem:[#allocation8 + $0x10] sm:$0xff] %v879_v56  ;;  %v882_v62 = vadd.f32 %v1328_v50, %v866_v13  ;;  %v865_v59 = vsub.f32 %v802_v57, %v1329_v51  ;;  %962 = vadd.xlane.f32.xlu0 %v944_v54  ;;  %v947_v31 = vmul.f32 %v866_v13, %v866_v13 }
 0x388   :  { %v1304_v4 = vpop.f32.mrf.mxu1 }
 0x389   :  { %898 = vst [vmem:[#allocation8 + $0x28] sm:$0xff] %v882_v62  ;;  %v881_v6 = vadd.f32 %v1329_v51, %v865_v59  ;;  %v868_v8 = vsub.f32 %v1304_v4, %v1330_v7  ;;  %968 = vadd.xlane.f32.xlu1 %v947_v31  ;;  %v946_v11 = vmul.f32 %v865_v59, %v865_v59 }
 0x38a   :  { %v812_v15 = vpop.f32.mrf.mxu1 }
 0x38b   :  { %897 = vst [vmem:[#allocation8 + $0x20] sm:$0xff] %v881_v6  ;;  %v884_v43 = vadd.f32 %v1330_v7, %v868_v8  ;;  %v867_v21 = vsub.f32 %v812_v15, %v1331_v17  ;;  %966 = vadd.xlane.f32.xlu0 %v946_v11  ;;  %v949_v23 = vmul.f32 %v868_v8, %v868_v8 }
 0x38c   :  { %v1307_v27 = vpop.f32.mrf.mxu1 }
 0x38d   :  { %900 = vst [vmem:[#allocation8 + $0x38] sm:$0xff] %v884_v43  ;;  %v883_v29 = vadd.f32 %v1331_v17, %v867_v21  ;;  %v870_v35 = vsub.f32 %v1307_v27, %v1332_v48  ;;  %972 = vadd.xlane.f32.xlu1 %v949_v23  ;;  %v948_v33 = vmul.f32 %v867_v21, %v867_v21 }
 0x38e   :  { %v822_v24 = vpop.f32.mrf.mxu1 }
 0x38f   :  { %899 = vst [vmem:[#allocation8 + $0x30] sm:$0xff] %v883_v29  ;;  %v886_v63 = vadd.f32 %v1332_v48, %v870_v35  ;;  %v869_v39 = vsub.f32 %v822_v24, %v1333_v41  ;;  %970 = vadd.xlane.f32.xlu0 %v948_v33  ;;  %v951_v32 = vmul.f32 %v870_v35, %v870_v35 }
 0x390   :  { %v1310_v34 = vpop.f32.mrf.mxu1 }
 0x391   :  { %902 = vst [vmem:[#allocation8 + $0x48] sm:$0xff] %v886_v63  ;;  %v885_v25 = vadd.f32 %v1333_v41, %v869_v39  ;;  %v872_v55 = vsub.f32 %v1310_v34, %v1334_v40  ;;  %976 = vadd.xlane.f32.xlu1 %v951_v32  ;;  %v950_v0 = vmul.f32 %v869_v39, %v869_v39 }
 0x392   :  { %v832_v10 = vpop.f32.mrf.mxu1 }
 0x393   :  { %901 = vst [vmem:[#allocation8 + $0x40] sm:$0xff] %v885_v25  ;;  %v888_v2 = vadd.f32 %v1334_v40, %v872_v55  ;;  %v871_v26 = vsub.f32 %v832_v10, %v1335_v37  ;;  %974 = vadd.xlane.f32.xlu0 %v950_v0  ;;  %v953_v44 = vmul.f32 %v872_v55, %v872_v55 }
 0x394   :  { %v1313_v1 = vpop.f32.mrf.mxu1 }
 0x395   :  { %904 = vst [vmem:[#allocation8 + $0x58] sm:$0xff] %v888_v2  ;;  %v887_v38 = vadd.f32 %v1335_v37, %v871_v26  ;;  %v874_v42 = vsub.f32 %v1313_v1, %v1336_v9  ;;  %980 = vadd.xlane.f32.xlu1 %v953_v44  ;;  %v952_v45 = vmul.f32 %v871_v26, %v871_v26 }
 0x396   :  { %v842_v14 = vpop.f32.mrf.mxu1 }
 0x397   :  { %903 = vst [vmem:[#allocation8 + $0x50] sm:$0xff] %v887_v38  ;;  %v890_v49 = vadd.f32 %v1336_v9, %v874_v42  ;;  %v873_v22 = vsub.f32 %v842_v14, %v1337_v46  ;;  %978 = vadd.xlane.f32.xlu0 %v952_v45  ;;  %v955_v47 = vmul.f32 %v874_v42, %v874_v42 }
 0x398   :  { %v1316_v18 = vpop.f32.mrf.mxu1 }
 0x399   :  { %906 = vst [vmem:[#allocation8 + $0x68] sm:$0xff] %v890_v49  ;;  %v889_v20 = vadd.f32 %v1337_v46, %v873_v22  ;;  %v876_v12 = vsub.f32 %v1316_v18, %v1338_v60  ;;  %984 = vadd.xlane.f32.xlu1 %v955_v47  ;;  %v954_v52 = vmul.f32 %v873_v22, %v873_v22 }
 0x39a   :  { %v852_v28 = vpop.f32.mrf.mxu1 }
 0x39b   :  { %905 = vst [vmem:[#allocation8 + $0x60] sm:$0xff] %v889_v20  ;;  %v892_v58 = vadd.f32 %v1338_v60, %v876_v12  ;;  %v875_v53 = vsub.f32 %v852_v28, %v1339_v16  ;;  %982 = vadd.xlane.f32.xlu0 %v954_v52  ;;  %v957_v36 = vmul.f32 %v876_v12, %v876_v12 }
 0x39d   :  { %908 = vst [vmem:[#allocation8 + $0x78] sm:$0xff] %v892_v58  ;;  %v891_v61 = vadd.f32 %v1339_v16, %v875_v53  ;;  %988 = vadd.xlane.f32.xlu1 %v957_v36  ;;  %v956_v19 = vmul.f32 %v875_v53, %v875_v53 }
 0x39f   :  { %907 = vst [vmem:[#allocation8 + $0x70] sm:$0xff] %v891_v61  ;;  %986 = vadd.xlane.f32.xlu0 %v956_v19 }
 0x3a1   :  { %1036 = vadd.xlane.f32.xlu1 %v1338_v60 }
 0x3a3   :  { %1034 = vadd.xlane.f32.xlu0 %v1339_v16 }
 0x3a4   :  { %1411 = shalt.err (!%p1408_p5)
}
 0x3a5   :  { %1081 = dma.vmem_to_hbm [thread:$0]  %s1076_s28, 2048, %s2319_s4, [#allocation4], %s1428_s14, %s1428_s14, %s1429_s15  }
 0x40a   :  { %v961_v5 = vpop.xlane.xlu1 %960 }
 0x40b   :  { %991 = vst.msk [vmem:[%s2322_s7 + $0x8] sm:$0xff] %vm909_vm0, %v961_v5 }
 0x40c   :  { %v959_v3 = vpop.xlane.xlu0 %958 }
 0x40d   :  { %990 = vst.msk [vmem:[%s2322_s7] sm:$0xff] %vm909_vm0, %v959_v3 }
 0x40e   :  { %v965_v30 = vpop.xlane.xlu1 %964 }
 0x40f   :  { %993 = vst.msk [vmem:[%s2322_s7 + $0x18] sm:$0xff] %vm909_vm0, %v965_v30 }
 0x410   :  { %v963_v56 = vpop.xlane.xlu0 %962 }
 0x411   :  { %992 = vst.msk [vmem:[%s2322_s7 + $0x10] sm:$0xff] %vm909_vm0, %v963_v56 }
 0x412   :  { %v969_v50 = vpop.xlane.xlu1 %968 }
 0x413   :  { %995 = vst.msk [vmem:[%s2322_s7 + $0x28] sm:$0xff] %vm909_vm0, %v969_v50 }
 0x414   :  { %v967_v13 = vpop.xlane.xlu0 %966 }
 0x415   :  { %994 = vst.msk [vmem:[%s2322_s7 + $0x20] sm:$0xff] %vm909_vm0, %v967_v13 }
 0x416   :  { %v973_v54 = vpop.xlane.xlu1 %972 }
 0x417   :  { %997 = vst.msk [vmem:[%s2322_s7 + $0x38] sm:$0xff] %vm909_vm0, %v973_v54 }
 0x418   :  { %v971_v57 = vpop.xlane.xlu0 %970 }
 0x419   :  { %996 = vst.msk [vmem:[%s2322_s7 + $0x30] sm:$0xff] %vm909_vm0, %v971_v57 }
 0x41a   :  { %v977_v62 = vpop.xlane.xlu1 %976 }
 0x41b   :  { %999 = vst.msk [vmem:[%s2322_s7 + $0x48] sm:$0xff] %vm909_vm0, %v977_v62 }
 0x41c   :  { %v975_v51 = vpop.xlane.xlu0 %974 }
 0x41d   :  { %998 = vst.msk [vmem:[%s2322_s7 + $0x40] sm:$0xff] %vm909_vm0, %v975_v51 }
 0x41e   :  { %v981_v59 = vpop.xlane.xlu1 %980 }
 0x41f   :  { %1001 = vst.msk [vmem:[%s2322_s7 + $0x58] sm:$0xff] %vm909_vm0, %v981_v59 }
 0x420   :  { %v979_v31 = vpop.xlane.xlu0 %978 }
 0x421   :  { %1000 = vst.msk [vmem:[%s2322_s7 + $0x50] sm:$0xff] %vm909_vm0, %v979_v31 }
 0x422   :  { %v985_v4 = vpop.xlane.xlu1 %984 }
 0x423   :  { %1003 = vst.msk [vmem:[%s2322_s7 + $0x68] sm:$0xff] %vm909_vm0, %v985_v4 }
 0x424   :  { %v983_v6 = vpop.xlane.xlu0 %982 }
 0x425   :  { %1002 = vst.msk [vmem:[%s2322_s7 + $0x60] sm:$0xff] %vm909_vm0, %v983_v6 }
 0x426   :  { %v989_v7 = vpop.xlane.xlu1 %988 }
 0x427   :  { %1005 = vst.msk [vmem:[%s2322_s7 + $0x78] sm:$0xff] %vm909_vm0, %v989_v7 }
 0x428   :  { %v987_v8 = vpop.xlane.xlu0 %986 }
 0x429   :  { %1004 = vst.msk [vmem:[%s2322_s7 + $0x70] sm:$0xff] %vm909_vm0, %v987_v8 }
 0x42a   :  { %v1037_v11 = vpop.xlane.xlu1 %1036 }
 0x42b   :  { %1053 = vst.msk [vmem:[%s2323_s8 + $0x78] sm:$0xff] %vm909_vm0, %v1037_v11 }
 0x42c   :  { %v1035_v15 = vpop.xlane.xlu0 %1034 }
 0x42d   :  { %1052 = vst.msk [vmem:[%s2323_s8 + $0x70] sm:$0xff] %vm909_vm0, %v1035_v15 }
 0x42e   :  { %1424 = dma.done.wait [#allocation4], 2048  }
 0x42f   :  { %1425 = vsyncadd [#allocation4], 4294965248 }
 0x430   :  { %1105 = vsyncpa [#allocation3], 1 }
 0x431   :  { %1106 = vsyncpa [#allocation6], 1 }
 0x432   :  { %1107 = vsyncpa [#allocation4], 1 }

</bundles_post_ra>
